<compile_context>
chip_gen: v5e
topology: v5e:2x2
jax: 0.10.0
libtpu: 0.0.40
codegen_flags: <defaults>
</compile_context>

<pallas_src>
import functools

import jax
import jax.numpy as jnp
from jax import lax
from jax.experimental import pallas as pl
from jax.experimental.pallas import tpu as pltpu


def _act_pair(x):
    """Return (antiderivTanh(x), tanh(x)) from a single exp().

    antiderivTanh(x) = |x| + log1p(exp(-2|x|))   ( = log(2 cosh x) )
    tanh(x)          = sgn(x) * (1 - e) / (1 + e),  e = exp(-2|x|)
    """
    ax = jnp.abs(x)
    e = jnp.exp(-2.0 * ax)
    anti = ax + jnp.log1p(e)
    th_abs = (1.0 - e) / (1.0 + e)
    th = jnp.where(x < 0.0, -th_abs, th_abs)
    return anti, th


def _ot_flow_kernel(zx_ref, ctx_ref, W0T_ref, W0xt_ref, b0_ref, Wi_ref, bi_ref,
                    w_ref, symA_ref, cw_ref, kop2_ref, trA_ref, out_ref,
                    *, d, nTh, nt, t0, t1):
    f32 = jnp.float32
    TB = zx_ref.shape[0]
    L = nTh - 1
    h_res = 1.0 / (nTh - 1)

    def mm(a, b):
        return jnp.dot(a, b, preferred_element_type=f32)

    # ------------- loop-invariant work: done ONCE per kernel invocation -------------
    x0 = zx_ref[...].astype(f32)                       # (TB, d)
    W0T = W0T_ref[...]                                 # (d+1+c, m)
    W0x = W0T[:d, :]                                   # (d, m)  spatial rows
    W0t = W0T[d:d + 1, :]                              # (1, m)  time row
    # context projection with bias folded in (ctx never changes during integration)
    ctx_proj = mm(ctx_ref[...].astype(f32), W0T[d + 1:, :]) + b0_ref[...]   # (TB, m)
    W0xt = W0xt_ref[...]                               # (m, d+1)
    Wi_list = [Wi_ref[i] for i in range(L)]            # (m, m), PyTorch [out, in]
    WiT_list = [Wi_list[i].T for i in range(L)]        # transposed once, reused 4*nt times
    bi_list = [bi_ref[i] for i in range(L)]            # (1, m)
    w_v = w_ref[...]                                   # (1, m)
    symA = symA_ref[...]                               # (d+1, d+1) = A^T A (pre-fused)
    symAx = symA[:d, :]
    symAt = symA[d:d + 1, :]
    cw = cw_ref[...]                                   # (1, d+1)
    kop2 = kop2_ref[...]                               # (1, m)  sum_k Kopen[:, k]^2
    trA = trA_ref[...]                                 # (1, 1)  trace(symA[:d, :d])

    def tr_hess(x, t):
        # ---- ResNet forward (cache tanh of every pre-activation) ----
        opening = mm(x, W0x) + t * W0t + ctx_proj                         # (TB, m)
        u0, tanhopen = _act_pair(opening)
        u = u0
        pre_tanh = []
        for i in range(1, nTh):
            p = mm(u, WiT_list[i - 1]) + bi_list[i - 1]
            anti, tp = _act_pair(p)
            pre_tanh.append(tp)
            u = u + h_res * anti

        # ---- backward pass for grad (batch-major z_i of shape (TB, m)) ----
        z = [None] * nTh
        for i in range(nTh - 1, 0, -1):
            term = w_v if i == nTh - 1 else z[i + 1]
            z[i] = term + h_res * mm(pre_tanh[i - 1] * term, Wi_list[i - 1])
        z0 = mm(tanhopen * z[1], W0xt)                                    # (TB, d+1)
        grad = z0 + mm(x, symAx) + t * symAt + cw                         # (TB, d+1)

        # ---- Hessian trace (spatial dims only) ----
        dT_open = 1.0 - tanhopen * tanhopen
        trH = jnp.sum(dT_open * z[1] * kop2, axis=1, keepdims=True)       # (TB, 1)

        # Jacobian columns stacked along the batch/sublane axis: one (d*TB, m) @ (m, m)
        # matmul per residual layer instead of d tiny ones, one fused reduction for t_i.
        jac = jnp.concatenate([tanhopen * W0x[k:k + 1, :] for k in range(d)], axis=0)
        for i in range(1, nTh):
            term = w_v if i == nTh - 1 else z[i + 1]
            tp = pre_tanh[i - 1]
            sc = (1.0 - tp * tp) * term                                   # (TB, m)
            KJ = mm(jac, WiT_list[i - 1])                                 # (d*TB, m)
            ksq = KJ[0:TB] * KJ[0:TB]
            for k in range(1, d):
                blk = KJ[k * TB:(k + 1) * TB]
                ksq = ksq + blk * blk
            trH = trH + h_res * jnp.sum(sc * ksq, axis=1, keepdims=True)
            jac = jac + h_res * jnp.concatenate([tp] * d, axis=0) * KJ
        trH = trH + trA                                                   # + trace(symA[:d,:d])
        return grad, trH

    def odefun(x, t):
        grad, trH = tr_hess(x, t)
        dx = -grad[:, :d]
        dl = -trH
        dv = 0.5 * jnp.sum(dx * dx, axis=1, keepdims=True)
        dr = jnp.abs(-grad[:, d:d + 1] + dv)
        return (dx, dl, dv, dr)

    def axpy(a, coef, b):
        return tuple(ai + coef * bi for ai, bi in zip(a, b))

    def smul(coef, a):
        return tuple(coef * ai for ai in a)

    hh = (t1 - t0) / nt

    def step_rk4(s0, tk):
        x = s0[0]
        K = smul(hh, odefun(x, tk))
        out = axpy(s0, 1.0 / 6.0, K)
        K = smul(hh, odefun(x + 0.5 * K[0], tk + 0.5 * hh))
        out = axpy(out, 2.0 / 6.0, K)
        K = smul(hh, odefun(x + 0.5 * K[0], tk + 0.5 * hh))
        out = axpy(out, 2.0 / 6.0, K)
        K = smul(hh, odefun(x + K[0], tk + hh))
        out = axpy(out, 1.0 / 6.0, K)
        return out

    def body(k, s):
        tk = t0 + hh * k.astype(f32)
        return step_rk4(s, tk)

    zeros1 = jnp.zeros((TB, 1), f32)
    state = lax.fori_loop(0, nt, body, (x0, zeros1, zeros1, zeros1))

    # Single lane-dense (TB, 128) output slab: [ y | delta_log_p | 0 padding ].
    out_ref[...] = jnp.zeros(out_ref.shape, out_ref.dtype)
    out_ref[:, :d] = state[0].astype(out_ref.dtype)
    out_ref[:, d:d + 1] = state[1].astype(out_ref.dtype)


def _prep_params(params, d):
    f32 = jnp.float32
    W0 = params["W0"].astype(f32)          # (m, d+1+c)
    b0 = params["b0"].astype(f32)          # (1, m)
    Wi = params["Wi"].astype(f32)          # (L, m, m)
    bi = params["bi"].astype(f32)          # (L, 1, m)
    w = params["w"].astype(f32)            # (1, m)
    A = params["A"].astype(f32)            # (r, d+1)
    cw = params["cw"].astype(f32)          # (1, d+1)
    W0T = W0.T                             # (d+1+c, m)
    W0xt = W0[:, :d + 1]                   # (m, d+1)
    symA = jnp.matmul(A.T, A, precision=lax.Precision.HIGHEST)      # (d+1, d+1)
    kop2 = jnp.sum(W0T[:d, :] ** 2, axis=0, keepdims=True)          # (1, m)
    trA = jnp.sum(A[:, :d] ** 2).reshape(1, 1)                      # (1, 1)
    return W0T, W0xt, b0, Wi, bi, w, symA, cw, kop2, trA


def ot_flow_forward(z, context, params, *, num_timesteps=8, reverse=False, block_b=256):
    """Pallas TPU implementation of OTFlow.forward -> (y, delta_log_py)."""
    t0, t1 = (1.0, 0.0) if reverse else (0.0, 1.0)
    B, d = z.shape
    c = context.shape[1]
    W0T, W0xt, b0, Wi, bi, w, symA, cw, kop2, trA = _prep_params(params, d)
    nTh = Wi.shape[0] + 1

    # Pad the batch so every grid block is full (padded rows are zeros and get dropped).
    B8 = ((B + 7) // 8) * 8
    TB = min(block_b, B8)
    B_pad = ((B8 + TB - 1) // TB) * TB
    zf = jnp.zeros((B_pad, d), jnp.float32).at[:B].set(z.astype(jnp.float32))
    cf = jnp.zeros((B_pad, c), jnp.float32).at[:B].set(context.astype(jnp.float32))

    out_w = 128 * pl.cdiv(d + 1, 128)   # lane-dense output slab width

    kernel = functools.partial(_ot_flow_kernel, d=d, nTh=nTh, nt=num_timesteps,
                               t0=float(t0), t1=float(t1))

    def full_spec(arr):
        nd = arr.ndim
        return pl.BlockSpec(arr.shape, lambda i: (0,) * nd)

    out = pl.pallas_call(
        kernel,
        out_shape=jax.ShapeDtypeStruct((B_pad, out_w), jnp.float32),
        grid=(B_pad // TB,),
        in_specs=[
            pl.BlockSpec((TB, d), lambda i: (i, 0)),       # z block
            pl.BlockSpec((TB, c), lambda i: (i, 0)),       # context block
            full_spec(W0T), full_spec(W0xt), full_spec(b0),
            full_spec(Wi), full_spec(bi), full_spec(w),
            full_spec(symA), full_spec(cw), full_spec(kop2), full_spec(trA),
        ],
        out_specs=pl.BlockSpec((TB, out_w), lambda i: (i, 0)),
        compiler_params=pltpu.CompilerParams(dimension_semantics=("parallel",)),
    )(zf, cf, W0T, W0xt, b0, Wi, bi, w, symA, cw, kop2, trA)

    y = out[:B, :d].astype(z.dtype)
    delta_log_py = out[:B, d].astype(z.dtype)
    return y, delta_log_py


def ot_flow_reference(z, context, params, *, num_timesteps=8, reverse=False):
    """Independent, un-optimized pure-JAX port of the PyTorch OTFlow forward
    (Phi.trHess / odefun / stepRK4 from the canonical OT-Flow implementation,
    context concatenated to the ResNet opening layer, alpha = 1)."""
    t0, t1 = (1.0, 0.0) if reverse else (0.0, 1.0)
    B, d = z.shape
    f32 = jnp.float32
    W0 = params["W0"].astype(f32)
    b0 = params["b0"].astype(f32)
    Wi = params["Wi"].astype(f32)
    bi = params["bi"].astype(f32)
    w = params["w"].astype(f32)
    A = params["A"].astype(f32)
    cw = params["cw"].astype(f32)
    nTh = Wi.shape[0] + 1
    h_res = 1.0 / (nTh - 1)
    symA = A.T @ A
    ctx = context.astype(f32)

    def antideriv_tanh(x):
        return jnp.abs(x) + jnp.log1p(jnp.exp(-2.0 * jnp.abs(x)))

    def deriv_tanh(x):
        return 1.0 - jnp.tanh(x) ** 2

    def tr_hess(s):
        sfull = jnp.concatenate([s, ctx], axis=1)                   # [x, t, context]
        opening = sfull @ W0.T + b0                                 # (B, m)
        u = [antideriv_tanh(opening)]
        for i in range(1, nTh):
            u.append(u[i - 1] + h_res * antideriv_tanh(u[i - 1] @ Wi[i - 1].T + bi[i - 1]))
        tanhopen = jnp.tanh(opening)

        zb = [None] * nTh
        for i in range(nTh - 1, 0, -1):
            term = w if i == nTh - 1 else zb[i + 1]
            pre = u[i - 1] @ Wi[i - 1].T + bi[i - 1]
            zb[i] = term + h_res * ((jnp.tanh(pre) * term) @ Wi[i - 1])
        z0 = (tanhopen * zb[1]) @ W0[:, :d + 1]                     # (B, d+1)
        grad = z0 + s @ symA + cw                                   # (B, d+1)

        Kopen = W0[:, :d]                                           # (m, d)
        trH = jnp.sum((deriv_tanh(opening) * zb[1]) @ (Kopen ** 2), axis=1)   # (B,)
        jac = [tanhopen * Kopen[:, k][None, :] for k in range(d)]
        for i in range(1, nTh):
            term = w if i == nTh - 1 else zb[i + 1]
            pre = u[i - 1] @ Wi[i - 1].T + bi[i - 1]
            tp = jnp.tanh(pre)
            dpre = deriv_tanh(pre)
            t_i = jnp.zeros((B,), f32)
            for k in range(d):
                KJ = jac[k] @ Wi[i - 1].T
                t_i = t_i + jnp.sum(dpre * term * KJ * KJ, axis=1)
                jac[k] = jac[k] + h_res * tp * KJ
            trH = trH + h_res * t_i
        trH = trH + jnp.trace(symA[:d, :d])
        return grad, trH

    def odefun(zf, t):
        x = zf[:, :d]
        s = jnp.concatenate([x, jnp.full((B, 1), t, f32)], axis=1)
        grad, trH = tr_hess(s)
        dx = -grad[:, :d]
        dl = -trH[:, None]
        dv = 0.5 * jnp.sum(dx * dx, axis=1, keepdims=True)
        dr = jnp.abs(-grad[:, d:d + 1] + dv)
        return jnp.concatenate([dx, dl, dv, dr], axis=1)

    def step_rk4(zf, tk, tk1):
        h = tk1 - tk
        K = h * odefun(zf, tk)
        z1 = zf + K / 6.0
        K = h * odefun(zf + 0.5 * K, tk + h / 2.0)
        z1 = z1 + K / 3.0
        K = h * odefun(zf + 0.5 * K, tk + h / 2.0)
        z1 = z1 + K / 3.0
        K = h * odefun(zf + K, tk + h)
        z1 = z1 + K / 6.0
        return z1

    zf = jnp.concatenate([z.astype(f32), jnp.zeros((B, 3), f32)], axis=1)
    h = (t1 - t0) / num_timesteps
    tk = t0
    for _ in range(num_timesteps):
        zf = step_rk4(zf, tk, tk + h)
        tk = tk + h
    return zf[:, :d].astype(z.dtype), zf[:, d].astype(z.dtype)


def init_params(key, input_dim, hidden_dim, context_dim, num_layers, r=10):
    """Deterministic synthetic parameters matching the OT-Flow Phi shapes."""
    d, m, c, nTh = input_dim, hidden_dim, context_dim, num_layers
    r = min(r, d + 1)
    din = d + 1 + c
    k0, k1, k2, k3, k4 = jax.random.split(key, 5)
    f32 = jnp.float32
    return dict(
        W0=0.2 * jax.random.normal(k0, (m, din), f32),          # ResNN opening layer
        b0=0.1 * jax.random.normal(k1, (1, m), f32),
        Wi=0.2 * jax.random.normal(k2, (nTh - 1, m, m), f32),   # residual layers
        bi=0.1 * jax.random.normal(k3, (nTh - 1, 1, m), f32),
        w=jnp.ones((1, m), f32),                                # OT-Flow init: w = 1
        A=0.2 * jax.random.normal(k4, (r, d + 1), f32),         # quadratic term
        cw=jnp.zeros((1, d + 1), f32),                          # OT-Flow init: c = 0
    )


if __name__ == "__main__":
    B = 8            # batch
    input_dim = 4    # dz
    hidden_dim = 32
    context_dim = 8
    num_layers = 2   # nTh
    num_timesteps = 8

    key = jax.random.PRNGKey(0)
    kx, kc, kp = jax.random.split(key, 3)
    z = jax.random.normal(kx, (B, input_dim), jnp.float32)
    context = jax.random.normal(kc, (B, context_dim), jnp.float32)
    params = init_params(kp, input_dim, hidden_dim, context_dim, num_layers)

    y, delta_log_py = ot_flow_forward(z, context, params, num_timesteps=num_timesteps)
    jax.block_until_ready((y, delta_log_py))

    with jax.default_matmul_precision("highest"):
        y_ref, dlp_ref = ot_flow_reference(z, context, params, num_timesteps=num_timesteps)
    jax.block_until_ready((y_ref, dlp_ref))

    assert y.shape == (B, input_dim) and delta_log_py.shape == (B,)
    assert bool(jnp.all(jnp.isfinite(y))) and bool(jnp.all(jnp.isfinite(delta_log_py)))
    assert bool(jnp.allclose(y, y_ref, rtol=1e-2, atol=1e-2)), "y mismatch vs independent reference"
    assert bool(jnp.allclose(delta_log_py, dlp_ref, rtol=1e-2, atol=1e-2)), "dlp mismatch vs independent reference"

    print("KERNEL_OK")
</pallas_src>

<mosaic_0001>
module attributes {stable_mosaic.version = 11 : i64} {
  func.func @_ot_flow_kernel(%arg0: i32, %arg1: memref<8x4xf32, #tpu.memory_space<vmem>>, %arg2: memref<8x8xf32, #tpu.memory_space<vmem>>, %arg3: memref<13x32xf32, #tpu.memory_space<vmem>>, %arg4: memref<32x5xf32, #tpu.memory_space<vmem>>, %arg5: memref<1x32xf32, #tpu.memory_space<vmem>>, %arg6: memref<1x32x32xf32, #tpu.memory_space<vmem>>, %arg7: memref<1x1x32xf32, #tpu.memory_space<vmem>>, %arg8: memref<1x32xf32, #tpu.memory_space<vmem>>, %arg9: memref<5x5xf32, #tpu.memory_space<vmem>>, %arg10: memref<1x5xf32, #tpu.memory_space<vmem>>, %arg11: memref<1x32xf32, #tpu.memory_space<vmem>>, %arg12: memref<1x1xf32, #tpu.memory_space<vmem>>, %arg13: memref<8x128xf32, #tpu.memory_space<vmem>>) attributes {dimension_semantics = [#tpu.dimension_semantics<parallel>], iteration_bounds = array<i64: 1>, scalar_prefetch = 0 : i64, scratch_operands = 0 : i64, tpu.core_type = #tpu.core_type<tc>, window_params = [{transform_indices = @transform_0, window_bounds = array<i64: 8, 4>}, {transform_indices = @transform_1, window_bounds = array<i64: 8, 8>}, {pipeline_mode = #tpu.pipeline_mode<synchronous>, transform_indices = @transform_2, window_bounds = array<i64: 13, 32>}, {pipeline_mode = #tpu.pipeline_mode<synchronous>, transform_indices = @transform_3, window_bounds = array<i64: 32, 5>}, {pipeline_mode = #tpu.pipeline_mode<synchronous>, transform_indices = @transform_4, window_bounds = array<i64: 1, 32>}, {pipeline_mode = #tpu.pipeline_mode<synchronous>, transform_indices = @transform_5, window_bounds = array<i64: 1, 32, 32>}, {pipeline_mode = #tpu.pipeline_mode<synchronous>, transform_indices = @transform_6, window_bounds = array<i64: 1, 1, 32>}, {pipeline_mode = #tpu.pipeline_mode<synchronous>, transform_indices = @transform_7, window_bounds = array<i64: 1, 32>}, {pipeline_mode = #tpu.pipeline_mode<synchronous>, transform_indices = @transform_8, window_bounds = array<i64: 5, 5>}, {pipeline_mode = #tpu.pipeline_mode<synchronous>, transform_indices = @transform_9, window_bounds = array<i64: 1, 5>}, {pipeline_mode = #tpu.pipeline_mode<synchronous>, transform_indices = @transform_10, window_bounds = array<i64: 1, 32>}, {pipeline_mode = #tpu.pipeline_mode<synchronous>, transform_indices = @transform_11, window_bounds = array<i64: 1, 1>}, {transform_indices = @transform_12, window_bounds = array<i64: 8, 128>}]} {
    %c0 = arith.constant 0 : index
    %c0_0 = arith.constant 0 : index
    %0 = vector.load %arg1[%c0, %c0_0] : memref<8x4xf32, #tpu.memory_space<vmem>>, vector<8x4xf32>
    %c0_1 = arith.constant 0 : index
    %c0_2 = arith.constant 0 : index
    %1 = vector.load %arg3[%c0_1, %c0_2] : memref<13x32xf32, #tpu.memory_space<vmem>>, vector<13x32xf32>
    %2 = vector.extract_strided_slice %1 {offsets = [0, 0], sizes = [4, 32], strides = [1, 1]} : vector<13x32xf32> to vector<4x32xf32>
    %3 = vector.extract_strided_slice %1 {offsets = [4, 0], sizes = [1, 32], strides = [1, 1]} : vector<13x32xf32> to vector<1x32xf32>
    %c0_3 = arith.constant 0 : index
    %c0_4 = arith.constant 0 : index
    %4 = vector.load %arg2[%c0_3, %c0_4] : memref<8x8xf32, #tpu.memory_space<vmem>>, vector<8x8xf32>
    %5 = vector.extract_strided_slice %1 {offsets = [5, 0], sizes = [8, 32], strides = [1, 1]} : vector<13x32xf32> to vector<8x32xf32>
    %cst = arith.constant dense<0.000000e+00> : vector<8x32xf32>
    %6 = tpu.matmul %4, %5, %cst {dimension_numbers = #tpu.dot_dimension_numbers<[1], [0], [0], [1], [0, 0, 1, 1], [], []>} : vector<8x8xf32>, vector<8x32xf32>, vector<8x32xf32> -> vector<8x32xf32>
    %c0_5 = arith.constant 0 : index
    %c0_6 = arith.constant 0 : index
    %7 = vector.load %arg5[%c0_5, %c0_6] : memref<1x32xf32, #tpu.memory_space<vmem>>, vector<1x32xf32>
    %8 = vector.broadcast %7 : vector<1x32xf32> to vector<8x32xf32>
    %9 = arith.addf %6, %8 : vector<8x32xf32>
    %c0_7 = arith.constant 0 : index
    %c0_8 = arith.constant 0 : index
    %10 = vector.load %arg4[%c0_7, %c0_8] : memref<32x5xf32, #tpu.memory_space<vmem>>, vector<32x5xf32>
    %c0_9 = arith.constant 0 : index
    %c0_10 = arith.constant 0 : index
    %c0_11 = arith.constant 0 : index
    %11 = vector.load %arg6[%c0_9, %c0_10, %c0_11] : memref<1x32x32xf32, #tpu.memory_space<vmem>>, vector<1x32x32xf32>
    %12 = vector.shape_cast %11 : vector<1x32x32xf32> to vector<32x32xf32>
    %13 = tpu.transpose %12, [1, 0] : vector<32x32xf32> -> vector<32x32xf32>
    %c0_12 = arith.constant 0 : index
    %c0_13 = arith.constant 0 : index
    %c0_14 = arith.constant 0 : index
    %14 = vector.load %arg7[%c0_12, %c0_13, %c0_14] : memref<1x1x32xf32, #tpu.memory_space<vmem>>, vector<1x1x32xf32>
    %15 = vector.shape_cast %14 : vector<1x1x32xf32> to vector<1x32xf32>
    %c0_15 = arith.constant 0 : index
    %c0_16 = arith.constant 0 : index
    %16 = vector.load %arg8[%c0_15, %c0_16] : memref<1x32xf32, #tpu.memory_space<vmem>>, vector<1x32xf32>
    %c0_17 = arith.constant 0 : index
    %c0_18 = arith.constant 0 : index
    %17 = vector.load %arg9[%c0_17, %c0_18] : memref<5x5xf32, #tpu.memory_space<vmem>>, vector<5x5xf32>
    %18 = vector.extract_strided_slice %17 {offsets = [0, 0], sizes = [4, 5], strides = [1, 1]} : vector<5x5xf32> to vector<4x5xf32>
    %19 = vector.extract_strided_slice %17 {offsets = [4, 0], sizes = [1, 5], strides = [1, 1]} : vector<5x5xf32> to vector<1x5xf32>
    %c0_19 = arith.constant 0 : index
    %c0_20 = arith.constant 0 : index
    %20 = vector.load %arg10[%c0_19, %c0_20] : memref<1x5xf32, #tpu.memory_space<vmem>>, vector<1x5xf32>
    %c0_21 = arith.constant 0 : index
    %c0_22 = arith.constant 0 : index
    %21 = vector.load %arg11[%c0_21, %c0_22] : memref<1x32xf32, #tpu.memory_space<vmem>>, vector<1x32xf32>
    %c0_23 = arith.constant 0 : index
    %c0_24 = arith.constant 0 : index
    %22 = vector.load %arg12[%c0_23, %c0_24] : memref<1x1xf32, #tpu.memory_space<vmem>>, vector<1x1xf32>
    %cst_25 = arith.constant 0.000000e+00 : f32
    %23 = vector.broadcast %cst_25 : f32 to vector<8x1xf32>
    %c0_i32 = arith.constant 0 : i32
    %c8_i32 = arith.constant 8 : i32
    %24 = arith.addi %c0_i32, %c8_i32 : i32
    %c1_i32 = arith.constant 1 : i32
    %25:2 = scf.for %arg14 = %c0_i32 to %24 step %c1_i32 iter_args(%arg15 = %0, %arg16 = %23) -> (vector<8x4xf32>, vector<8x1xf32>)  : i32 {
      %30 = arith.sitofp %arg14 : i32 to f32
      %cst_33 = arith.constant 1.250000e-01 : f32
      %31 = arith.mulf %cst_33, %30 : f32
      %cst_34 = arith.constant 0.000000e+00 : f32
      %32 = arith.addf %cst_34, %31 : f32
      %cst_35 = arith.constant dense<0.000000e+00> : vector<8x32xf32>
      %33 = tpu.matmul %arg15, %2, %cst_35 {dimension_numbers = #tpu.dot_dimension_numbers<[1], [0], [0], [1], [0, 0, 1, 1], [], []>} : vector<8x4xf32>, vector<4x32xf32>, vector<8x32xf32> -> vector<8x32xf32>
      %34 = vector.broadcast %32 : f32 to vector<1x32xf32>
      %35 = arith.mulf %34, %3 : vector<1x32xf32>
      %36 = vector.broadcast %35 : vector<1x32xf32> to vector<8x32xf32>
      %37 = arith.addf %33, %36 : vector<8x32xf32>
      %38 = arith.addf %37, %9 : vector<8x32xf32>
      %39 = math.absf %38 : vector<8x32xf32>
      %cst_36 = arith.constant -2.000000e+00 : f32
      %40 = vector.broadcast %cst_36 : f32 to vector<8x32xf32>
      %41 = arith.mulf %40, %39 : vector<8x32xf32>
      %42 = math.exp %41 : vector<8x32xf32>
      %43 = math.log1p %42 : vector<8x32xf32>
      %44 = arith.addf %39, %43 : vector<8x32xf32>
      %cst_37 = arith.constant 1.000000e+00 : f32
      %45 = vector.broadcast %cst_37 : f32 to vector<8x32xf32>
      %46 = arith.subf %45, %42 : vector<8x32xf32>
      %cst_38 = arith.constant 1.000000e+00 : f32
      %47 = vector.broadcast %cst_38 : f32 to vector<8x32xf32>
      %48 = arith.addf %47, %42 : vector<8x32xf32>
      %49 = arith.divf %46, %48 : vector<8x32xf32>
      %cst_39 = arith.constant 0.000000e+00 : f32
      %50 = vector.broadcast %cst_39 : f32 to vector<8x32xf32>
      %51 = arith.cmpf olt, %38, %50 : vector<8x32xf32>
      %cst_40 = arith.constant 0.000000e+00 : f32
      %52 = vector.broadcast %cst_40 : f32 to vector<8x32xf32>
      %53 = arith.subf %52, %49 : vector<8x32xf32>
      %54 = arith.select %51, %53, %49 : vector<8x32xi1>, vector<8x32xf32>
      %cst_41 = arith.constant dense<0.000000e+00> : vector<8x32xf32>
      %55 = tpu.matmul %44, %13, %cst_41 {dimension_numbers = #tpu.dot_dimension_numbers<[1], [0], [0], [1], [0, 0, 1, 1], [], []>} : vector<8x32xf32>, vector<32x32xf32>, vector<8x32xf32> -> vector<8x32xf32>
      %56 = vector.broadcast %15 : vector<1x32xf32> to vector<8x32xf32>
      %57 = arith.addf %55, %56 : vector<8x32xf32>
      %58 = math.absf %57 : vector<8x32xf32>
      %cst_42 = arith.constant -2.000000e+00 : f32
      %59 = vector.broadcast %cst_42 : f32 to vector<8x32xf32>
      %60 = arith.mulf %59, %58 : vector<8x32xf32>
      %61 = math.exp %60 : vector<8x32xf32>
      %cst_43 = arith.constant 1.000000e+00 : f32
      %62 = vector.broadcast %cst_43 : f32 to vector<8x32xf32>
      %63 = arith.subf %62, %61 : vector<8x32xf32>
      %cst_44 = arith.constant 1.000000e+00 : f32
      %64 = vector.broadcast %cst_44 : f32 to vector<8x32xf32>
      %65 = arith.addf %64, %61 : vector<8x32xf32>
      %66 = arith.divf %63, %65 : vector<8x32xf32>
      %cst_45 = arith.constant 0.000000e+00 : f32
      %67 = vector.broadcast %cst_45 : f32 to vector<8x32xf32>
      %68 = arith.cmpf olt, %57, %67 : vector<8x32xf32>
      %cst_46 = arith.constant 0.000000e+00 : f32
      %69 = vector.broadcast %cst_46 : f32 to vector<8x32xf32>
      %70 = arith.subf %69, %66 : vector<8x32xf32>
      %71 = arith.select %68, %70, %66 : vector<8x32xi1>, vector<8x32xf32>
      %72 = vector.broadcast %16 : vector<1x32xf32> to vector<8x32xf32>
      %73 = arith.mulf %71, %72 : vector<8x32xf32>
      %cst_47 = arith.constant dense<0.000000e+00> : vector<8x32xf32>
      %74 = tpu.matmul %73, %12, %cst_47 {dimension_numbers = #tpu.dot_dimension_numbers<[1], [0], [0], [1], [0, 0, 1, 1], [], []>} : vector<8x32xf32>, vector<32x32xf32>, vector<8x32xf32> -> vector<8x32xf32>
      %cst_48 = arith.constant 1.000000e+00 : f32
      %75 = vector.broadcast %cst_48 : f32 to vector<8x32xf32>
      %76 = arith.mulf %75, %74 : vector<8x32xf32>
      %77 = vector.broadcast %16 : vector<1x32xf32> to vector<8x32xf32>
      %78 = arith.addf %77, %76 : vector<8x32xf32>
      %79 = arith.mulf %54, %78 : vector<8x32xf32>
      %cst_49 = arith.constant dense<0.000000e+00> : vector<8x5xf32>
      %80 = tpu.matmul %79, %10, %cst_49 {dimension_numbers = #tpu.dot_dimension_numbers<[1], [0], [0], [1], [0, 0, 1, 1], [], []>} : vector<8x32xf32>, vector<32x5xf32>, vector<8x5xf32> -> vector<8x5xf32>
      %cst_50 = arith.constant dense<0.000000e+00> : vector<8x5xf32>
      %81 = tpu.matmul %arg15, %18, %cst_50 {dimension_numbers = #tpu.dot_dimension_numbers<[1], [0], [0], [1], [0, 0, 1, 1], [], []>} : vector<8x4xf32>, vector<4x5xf32>, vector<8x5xf32> -> vector<8x5xf32>
      %82 = arith.addf %80, %81 : vector<8x5xf32>
      %83 = vector.broadcast %32 : f32 to vector<1x5xf32>
      %84 = arith.mulf %83, %19 : vector<1x5xf32>
      %85 = vector.broadcast %84 : vector<1x5xf32> to vector<8x5xf32>
      %86 = arith.addf %82, %85 : vector<8x5xf32>
      %87 = vector.broadcast %20 : vector<1x5xf32> to vector<8x5xf32>
      %88 = arith.addf %86, %87 : vector<8x5xf32>
      %89 = arith.mulf %54, %54 : vector<8x32xf32>
      %cst_51 = arith.constant 1.000000e+00 : f32
      %90 = vector.broadcast %cst_51 : f32 to vector<8x32xf32>
      %91 = arith.subf %90, %89 : vector<8x32xf32>
      %92 = arith.mulf %91, %78 : vector<8x32xf32>
      %93 = vector.broadcast %21 : vector<1x32xf32> to vector<8x32xf32>
      %94 = arith.mulf %92, %93 : vector<8x32xf32>
      %cst_52 = arith.constant dense<0.000000e+00> : vector<8xf32>
      %95 = vector.multi_reduction <add>, %94, %cst_52 [1] : vector<8x32xf32> to vector<8xf32>
      %96 = vector.shape_cast %95 : vector<8xf32> to vector<8x1xf32>
      %97 = vector.extract_strided_slice %2 {offsets = [0, 0], sizes = [1, 32], strides = [1, 1]} : vector<4x32xf32> to vector<1x32xf32>
      %98 = vector.broadcast %97 : vector<1x32xf32> to vector<8x32xf32>
      %99 = arith.mulf %54, %98 : vector<8x32xf32>
      %100 = vector.extract_strided_slice %2 {offsets = [1, 0], sizes = [1, 32], strides = [1, 1]} : vector<4x32xf32> to vector<1x32xf32>
      %101 = vector.broadcast %100 : vector<1x32xf32> to vector<8x32xf32>
      %102 = arith.mulf %54, %101 : vector<8x32xf32>
      %103 = vector.extract_strided_slice %2 {offsets = [2, 0], sizes = [1, 32], strides = [1, 1]} : vector<4x32xf32> to vector<1x32xf32>
      %104 = vector.broadcast %103 : vector<1x32xf32> to vector<8x32xf32>
      %105 = arith.mulf %54, %104 : vector<8x32xf32>
      %106 = vector.extract_strided_slice %2 {offsets = [3, 0], sizes = [1, 32], strides = [1, 1]} : vector<4x32xf32> to vector<1x32xf32>
      %107 = vector.broadcast %106 : vector<1x32xf32> to vector<8x32xf32>
      %108 = arith.mulf %54, %107 : vector<8x32xf32>
      %109 = tpu.concatenate %99, %102, %105, %108 in 0 : vector<8x32xf32>, vector<8x32xf32>, vector<8x32xf32>, vector<8x32xf32> -> vector<32x32xf32>
      %110 = arith.mulf %71, %71 : vector<8x32xf32>
      %cst_53 = arith.constant 1.000000e+00 : f32
      %111 = vector.broadcast %cst_53 : f32 to vector<8x32xf32>
      %112 = arith.subf %111, %110 : vector<8x32xf32>
      %113 = vector.broadcast %16 : vector<1x32xf32> to vector<8x32xf32>
      %114 = arith.mulf %112, %113 : vector<8x32xf32>
      %cst_54 = arith.constant dense<0.000000e+00> : vector<32x32xf32>
      %115 = tpu.matmul %109, %13, %cst_54 {dimension_numbers = #tpu.dot_dimension_numbers<[1], [0], [0], [1], [0, 0, 1, 1], [], []>} : vector<32x32xf32>, vector<32x32xf32>, vector<32x32xf32> -> vector<32x32xf32>
      %116 = vector.extract_strided_slice %115 {offsets = [0, 0], sizes = [8, 32], strides = [1, 1]} : vector<32x32xf32> to vector<8x32xf32>
      %117 = vector.extract_strided_slice %115 {offsets = [0, 0], sizes = [8, 32], strides = [1, 1]} : vector<32x32xf32> to vector<8x32xf32>
      %118 = arith.mulf %116, %117 : vector<8x32xf32>
      %119 = vector.extract_strided_slice %115 {offsets = [8, 0], sizes = [8, 32], strides = [1, 1]} : vector<32x32xf32> to vector<8x32xf32>
      %120 = arith.mulf %119, %119 : vector<8x32xf32>
      %121 = arith.addf %118, %120 : vector<8x32xf32>
      %122 = vector.extract_strided_slice %115 {offsets = [16, 0], sizes = [8, 32], strides = [1, 1]} : vector<32x32xf32> to vector<8x32xf32>
      %123 = arith.mulf %122, %122 : vector<8x32xf32>
      %124 = arith.addf %121, %123 : vector<8x32xf32>
      %125 = vector.extract_strided_slice %115 {offsets = [24, 0], sizes = [8, 32], strides = [1, 1]} : vector<32x32xf32> to vector<8x32xf32>
      %126 = arith.mulf %125, %125 : vector<8x32xf32>
      %127 = arith.addf %124, %126 : vector<8x32xf32>
      %128 = arith.mulf %114, %127 : vector<8x32xf32>
      %cst_55 = arith.constant dense<0.000000e+00> : vector<8xf32>
      %129 = vector.multi_reduction <add>, %128, %cst_55 [1] : vector<8x32xf32> to vector<8xf32>
      %130 = vector.shape_cast %129 : vector<8xf32> to vector<8x1xf32>
      %cst_56 = arith.constant 1.000000e+00 : f32
      %131 = vector.broadcast %cst_56 : f32 to vector<8x1xf32>
      %132 = arith.mulf %131, %130 : vector<8x1xf32>
      %133 = arith.addf %96, %132 : vector<8x1xf32>
      %134 = vector.broadcast %22 : vector<1x1xf32> to vector<8x1xf32>
      %135 = arith.addf %133, %134 : vector<8x1xf32>
      %136 = vector.extract_strided_slice %88 {offsets = [0, 0], sizes = [8, 4], strides = [1, 1]} : vector<8x5xf32> to vector<8x4xf32>
      %cst_57 = arith.constant 0.000000e+00 : f32
      %137 = vector.broadcast %cst_57 : f32 to vector<8x4xf32>
      %138 = arith.subf %137, %136 : vector<8x4xf32>
      %cst_58 = arith.constant 0.000000e+00 : f32
      %139 = vector.broadcast %cst_58 : f32 to vector<8x1xf32>
      %140 = arith.subf %139, %135 : vector<8x1xf32>
      %cst_59 = arith.constant 1.250000e-01 : f32
      %141 = vector.broadcast %cst_59 : f32 to vector<8x4xf32>
      %142 = arith.mulf %141, %138 : vector<8x4xf32>
      %cst_60 = arith.constant 1.250000e-01 : f32
      %143 = vector.broadcast %cst_60 : f32 to vector<8x1xf32>
      %144 = arith.mulf %143, %140 : vector<8x1xf32>
      %cst_61 = arith.constant 0.166666672 : f32
      %145 = vector.broadcast %cst_61 : f32 to vector<8x4xf32>
      %146 = arith.mulf %145, %142 : vector<8x4xf32>
      %147 = arith.addf %arg15, %146 : vector<8x4xf32>
      %cst_62 = arith.constant 0.166666672 : f32
      %148 = vector.broadcast %cst_62 : f32 to vector<8x1xf32>
      %149 = arith.mulf %148, %144 : vector<8x1xf32>
      %150 = arith.addf %arg16, %149 : vector<8x1xf32>
      %cst_63 = arith.constant 5.000000e-01 : f32
      %151 = vector.broadcast %cst_63 : f32 to vector<8x4xf32>
      %152 = arith.mulf %151, %142 : vector<8x4xf32>
      %153 = arith.addf %arg15, %152 : vector<8x4xf32>
      %cst_64 = arith.constant 6.250000e-02 : f32
      %154 = arith.addf %32, %cst_64 : f32
      %cst_65 = arith.constant dense<0.000000e+00> : vector<8x32xf32>
      %155 = tpu.matmul %153, %2, %cst_65 {dimension_numbers = #tpu.dot_dimension_numbers<[1], [0], [0], [1], [0, 0, 1, 1], [], []>} : vector<8x4xf32>, vector<4x32xf32>, vector<8x32xf32> -> vector<8x32xf32>
      %156 = vector.broadcast %154 : f32 to vector<1x32xf32>
      %157 = arith.mulf %156, %3 : vector<1x32xf32>
      %158 = vector.broadcast %157 : vector<1x32xf32> to vector<8x32xf32>
      %159 = arith.addf %155, %158 : vector<8x32xf32>
      %160 = arith.addf %159, %9 : vector<8x32xf32>
      %161 = math.absf %160 : vector<8x32xf32>
      %cst_66 = arith.constant -2.000000e+00 : f32
      %162 = vector.broadcast %cst_66 : f32 to vector<8x32xf32>
      %163 = arith.mulf %162, %161 : vector<8x32xf32>
      %164 = math.exp %163 : vector<8x32xf32>
      %165 = math.log1p %164 : vector<8x32xf32>
      %166 = arith.addf %161, %165 : vector<8x32xf32>
      %cst_67 = arith.constant 1.000000e+00 : f32
      %167 = vector.broadcast %cst_67 : f32 to vector<8x32xf32>
      %168 = arith.subf %167, %164 : vector<8x32xf32>
      %cst_68 = arith.constant 1.000000e+00 : f32
      %169 = vector.broadcast %cst_68 : f32 to vector<8x32xf32>
      %170 = arith.addf %169, %164 : vector<8x32xf32>
      %171 = arith.divf %168, %170 : vector<8x32xf32>
      %cst_69 = arith.constant 0.000000e+00 : f32
      %172 = vector.broadcast %cst_69 : f32 to vector<8x32xf32>
      %173 = arith.cmpf olt, %160, %172 : vector<8x32xf32>
      %cst_70 = arith.constant 0.000000e+00 : f32
      %174 = vector.broadcast %cst_70 : f32 to vector<8x32xf32>
      %175 = arith.subf %174, %171 : vector<8x32xf32>
      %176 = arith.select %173, %175, %171 : vector<8x32xi1>, vector<8x32xf32>
      %cst_71 = arith.constant dense<0.000000e+00> : vector<8x32xf32>
      %177 = tpu.matmul %166, %13, %cst_71 {dimension_numbers = #tpu.dot_dimension_numbers<[1], [0], [0], [1], [0, 0, 1, 1], [], []>} : vector<8x32xf32>, vector<32x32xf32>, vector<8x32xf32> -> vector<8x32xf32>
      %178 = vector.broadcast %15 : vector<1x32xf32> to vector<8x32xf32>
      %179 = arith.addf %177, %178 : vector<8x32xf32>
      %180 = math.absf %179 : vector<8x32xf32>
      %cst_72 = arith.constant -2.000000e+00 : f32
      %181 = vector.broadcast %cst_72 : f32 to vector<8x32xf32>
      %182 = arith.mulf %181, %180 : vector<8x32xf32>
      %183 = math.exp %182 : vector<8x32xf32>
      %cst_73 = arith.constant 1.000000e+00 : f32
      %184 = vector.broadcast %cst_73 : f32 to vector<8x32xf32>
      %185 = arith.subf %184, %183 : vector<8x32xf32>
      %cst_74 = arith.constant 1.000000e+00 : f32
      %186 = vector.broadcast %cst_74 : f32 to vector<8x32xf32>
      %187 = arith.addf %186, %183 : vector<8x32xf32>
      %188 = arith.divf %185, %187 : vector<8x32xf32>
      %cst_75 = arith.constant 0.000000e+00 : f32
      %189 = vector.broadcast %cst_75 : f32 to vector<8x32xf32>
      %190 = arith.cmpf olt, %179, %189 : vector<8x32xf32>
      %cst_76 = arith.constant 0.000000e+00 : f32
      %191 = vector.broadcast %cst_76 : f32 to vector<8x32xf32>
      %192 = arith.subf %191, %188 : vector<8x32xf32>
      %193 = arith.select %190, %192, %188 : vector<8x32xi1>, vector<8x32xf32>
      %194 = vector.broadcast %16 : vector<1x32xf32> to vector<8x32xf32>
      %195 = arith.mulf %193, %194 : vector<8x32xf32>
      %cst_77 = arith.constant dense<0.000000e+00> : vector<8x32xf32>
      %196 = tpu.matmul %195, %12, %cst_77 {dimension_numbers = #tpu.dot_dimension_numbers<[1], [0], [0], [1], [0, 0, 1, 1], [], []>} : vector<8x32xf32>, vector<32x32xf32>, vector<8x32xf32> -> vector<8x32xf32>
      %cst_78 = arith.constant 1.000000e+00 : f32
      %197 = vector.broadcast %cst_78 : f32 to vector<8x32xf32>
      %198 = arith.mulf %197, %196 : vector<8x32xf32>
      %199 = vector.broadcast %16 : vector<1x32xf32> to vector<8x32xf32>
      %200 = arith.addf %199, %198 : vector<8x32xf32>
      %201 = arith.mulf %176, %200 : vector<8x32xf32>
      %cst_79 = arith.constant dense<0.000000e+00> : vector<8x5xf32>
      %202 = tpu.matmul %201, %10, %cst_79 {dimension_numbers = #tpu.dot_dimension_numbers<[1], [0], [0], [1], [0, 0, 1, 1], [], []>} : vector<8x32xf32>, vector<32x5xf32>, vector<8x5xf32> -> vector<8x5xf32>
      %cst_80 = arith.constant dense<0.000000e+00> : vector<8x5xf32>
      %203 = tpu.matmul %153, %18, %cst_80 {dimension_numbers = #tpu.dot_dimension_numbers<[1], [0], [0], [1], [0, 0, 1, 1], [], []>} : vector<8x4xf32>, vector<4x5xf32>, vector<8x5xf32> -> vector<8x5xf32>
      %204 = arith.addf %202, %203 : vector<8x5xf32>
      %205 = vector.broadcast %154 : f32 to vector<1x5xf32>
      %206 = arith.mulf %205, %19 : vector<1x5xf32>
      %207 = vector.broadcast %206 : vector<1x5xf32> to vector<8x5xf32>
      %208 = arith.addf %204, %207 : vector<8x5xf32>
      %209 = vector.broadcast %20 : vector<1x5xf32> to vector<8x5xf32>
      %210 = arith.addf %208, %209 : vector<8x5xf32>
      %211 = arith.mulf %176, %176 : vector<8x32xf32>
      %cst_81 = arith.constant 1.000000e+00 : f32
      %212 = vector.broadcast %cst_81 : f32 to vector<8x32xf32>
      %213 = arith.subf %212, %211 : vector<8x32xf32>
      %214 = arith.mulf %213, %200 : vector<8x32xf32>
      %215 = vector.broadcast %21 : vector<1x32xf32> to vector<8x32xf32>
      %216 = arith.mulf %214, %215 : vector<8x32xf32>
      %cst_82 = arith.constant dense<0.000000e+00> : vector<8xf32>
      %217 = vector.multi_reduction <add>, %216, %cst_82 [1] : vector<8x32xf32> to vector<8xf32>
      %218 = vector.shape_cast %217 : vector<8xf32> to vector<8x1xf32>
      %219 = vector.extract_strided_slice %2 {offsets = [0, 0], sizes = [1, 32], strides = [1, 1]} : vector<4x32xf32> to vector<1x32xf32>
      %220 = vector.broadcast %219 : vector<1x32xf32> to vector<8x32xf32>
      %221 = arith.mulf %176, %220 : vector<8x32xf32>
      %222 = vector.extract_strided_slice %2 {offsets = [1, 0], sizes = [1, 32], strides = [1, 1]} : vector<4x32xf32> to vector<1x32xf32>
      %223 = vector.broadcast %222 : vector<1x32xf32> to vector<8x32xf32>
      %224 = arith.mulf %176, %223 : vector<8x32xf32>
      %225 = vector.extract_strided_slice %2 {offsets = [2, 0], sizes = [1, 32], strides = [1, 1]} : vector<4x32xf32> to vector<1x32xf32>
      %226 = vector.broadcast %225 : vector<1x32xf32> to vector<8x32xf32>
      %227 = arith.mulf %176, %226 : vector<8x32xf32>
      %228 = vector.extract_strided_slice %2 {offsets = [3, 0], sizes = [1, 32], strides = [1, 1]} : vector<4x32xf32> to vector<1x32xf32>
      %229 = vector.broadcast %228 : vector<1x32xf32> to vector<8x32xf32>
      %230 = arith.mulf %176, %229 : vector<8x32xf32>
      %231 = tpu.concatenate %221, %224, %227, %230 in 0 : vector<8x32xf32>, vector<8x32xf32>, vector<8x32xf32>, vector<8x32xf32> -> vector<32x32xf32>
      %232 = arith.mulf %193, %193 : vector<8x32xf32>
      %cst_83 = arith.constant 1.000000e+00 : f32
      %233 = vector.broadcast %cst_83 : f32 to vector<8x32xf32>
      %234 = arith.subf %233, %232 : vector<8x32xf32>
      %235 = vector.broadcast %16 : vector<1x32xf32> to vector<8x32xf32>
      %236 = arith.mulf %234, %235 : vector<8x32xf32>
      %cst_84 = arith.constant dense<0.000000e+00> : vector<32x32xf32>
      %237 = tpu.matmul %231, %13, %cst_84 {dimension_numbers = #tpu.dot_dimension_numbers<[1], [0], [0], [1], [0, 0, 1, 1], [], []>} : vector<32x32xf32>, vector<32x32xf32>, vector<32x32xf32> -> vector<32x32xf32>
      %238 = vector.extract_strided_slice %237 {offsets = [0, 0], sizes = [8, 32], strides = [1, 1]} : vector<32x32xf32> to vector<8x32xf32>
      %239 = vector.extract_strided_slice %237 {offsets = [0, 0], sizes = [8, 32], strides = [1, 1]} : vector<32x32xf32> to vector<8x32xf32>
      %240 = arith.mulf %238, %239 : vector<8x32xf32>
      %241 = vector.extract_strided_slice %237 {offsets = [8, 0], sizes = [8, 32], strides = [1, 1]} : vector<32x32xf32> to vector<8x32xf32>
      %242 = arith.mulf %241, %241 : vector<8x32xf32>
      %243 = arith.addf %240, %242 : vector<8x32xf32>
      %244 = vector.extract_strided_slice %237 {offsets = [16, 0], sizes = [8, 32], strides = [1, 1]} : vector<32x32xf32> to vector<8x32xf32>
      %245 = arith.mulf %244, %244 : vector<8x32xf32>
      %246 = arith.addf %243, %245 : vector<8x32xf32>
      %247 = vector.extract_strided_slice %237 {offsets = [24, 0], sizes = [8, 32], strides = [1, 1]} : vector<32x32xf32> to vector<8x32xf32>
      %248 = arith.mulf %247, %247 : vector<8x32xf32>
      %249 = arith.addf %246, %248 : vector<8x32xf32>
      %250 = arith.mulf %236, %249 : vector<8x32xf32>
      %cst_85 = arith.constant dense<0.000000e+00> : vector<8xf32>
      %251 = vector.multi_reduction <add>, %250, %cst_85 [1] : vector<8x32xf32> to vector<8xf32>
      %252 = vector.shape_cast %251 : vector<8xf32> to vector<8x1xf32>
      %cst_86 = arith.constant 1.000000e+00 : f32
      %253 = vector.broadcast %cst_86 : f32 to vector<8x1xf32>
      %254 = arith.mulf %253, %252 : vector<8x1xf32>
      %255 = arith.addf %218, %254 : vector<8x1xf32>
      %256 = vector.broadcast %22 : vector<1x1xf32> to vector<8x1xf32>
      %257 = arith.addf %255, %256 : vector<8x1xf32>
      %258 = vector.extract_strided_slice %210 {offsets = [0, 0], sizes = [8, 4], strides = [1, 1]} : vector<8x5xf32> to vector<8x4xf32>
      %cst_87 = arith.constant 0.000000e+00 : f32
      %259 = vector.broadcast %cst_87 : f32 to vector<8x4xf32>
      %260 = arith.subf %259, %258 : vector<8x4xf32>
      %cst_88 = arith.constant 0.000000e+00 : f32
      %261 = vector.broadcast %cst_88 : f32 to vector<8x1xf32>
      %262 = arith.subf %261, %257 : vector<8x1xf32>
      %cst_89 = arith.constant 1.250000e-01 : f32
      %263 = vector.broadcast %cst_89 : f32 to vector<8x4xf32>
      %264 = arith.mulf %263, %260 : vector<8x4xf32>
      %cst_90 = arith.constant 1.250000e-01 : f32
      %265 = vector.broadcast %cst_90 : f32 to vector<8x1xf32>
      %266 = arith.mulf %265, %262 : vector<8x1xf32>
      %cst_91 = arith.constant 0.333333343 : f32
      %267 = vector.broadcast %cst_91 : f32 to vector<8x4xf32>
      %268 = arith.mulf %267, %264 : vector<8x4xf32>
      %269 = arith.addf %147, %268 : vector<8x4xf32>
      %cst_92 = arith.constant 0.333333343 : f32
      %270 = vector.broadcast %cst_92 : f32 to vector<8x1xf32>
      %271 = arith.mulf %270, %266 : vector<8x1xf32>
      %272 = arith.addf %150, %271 : vector<8x1xf32>
      %cst_93 = arith.constant 5.000000e-01 : f32
      %273 = vector.broadcast %cst_93 : f32 to vector<8x4xf32>
      %274 = arith.mulf %273, %264 : vector<8x4xf32>
      %275 = arith.addf %arg15, %274 : vector<8x4xf32>
      %cst_94 = arith.constant 6.250000e-02 : f32
      %276 = arith.addf %32, %cst_94 : f32
      %cst_95 = arith.constant dense<0.000000e+00> : vector<8x32xf32>
      %277 = tpu.matmul %275, %2, %cst_95 {dimension_numbers = #tpu.dot_dimension_numbers<[1], [0], [0], [1], [0, 0, 1, 1], [], []>} : vector<8x4xf32>, vector<4x32xf32>, vector<8x32xf32> -> vector<8x32xf32>
      %278 = vector.broadcast %276 : f32 to vector<1x32xf32>
      %279 = arith.mulf %278, %3 : vector<1x32xf32>
      %280 = vector.broadcast %279 : vector<1x32xf32> to vector<8x32xf32>
      %281 = arith.addf %277, %280 : vector<8x32xf32>
      %282 = arith.addf %281, %9 : vector<8x32xf32>
      %283 = math.absf %282 : vector<8x32xf32>
      %cst_96 = arith.constant -2.000000e+00 : f32
      %284 = vector.broadcast %cst_96 : f32 to vector<8x32xf32>
      %285 = arith.mulf %284, %283 : vector<8x32xf32>
      %286 = math.exp %285 : vector<8x32xf32>
      %287 = math.log1p %286 : vector<8x32xf32>
      %288 = arith.addf %283, %287 : vector<8x32xf32>
      %cst_97 = arith.constant 1.000000e+00 : f32
      %289 = vector.broadcast %cst_97 : f32 to vector<8x32xf32>
      %290 = arith.subf %289, %286 : vector<8x32xf32>
      %cst_98 = arith.constant 1.000000e+00 : f32
      %291 = vector.broadcast %cst_98 : f32 to vector<8x32xf32>
      %292 = arith.addf %291, %286 : vector<8x32xf32>
      %293 = arith.divf %290, %292 : vector<8x32xf32>
      %cst_99 = arith.constant 0.000000e+00 : f32
      %294 = vector.broadcast %cst_99 : f32 to vector<8x32xf32>
      %295 = arith.cmpf olt, %282, %294 : vector<8x32xf32>
      %cst_100 = arith.constant 0.000000e+00 : f32
      %296 = vector.broadcast %cst_100 : f32 to vector<8x32xf32>
      %297 = arith.subf %296, %293 : vector<8x32xf32>
      %298 = arith.select %295, %297, %293 : vector<8x32xi1>, vector<8x32xf32>
      %cst_101 = arith.constant dense<0.000000e+00> : vector<8x32xf32>
      %299 = tpu.matmul %288, %13, %cst_101 {dimension_numbers = #tpu.dot_dimension_numbers<[1], [0], [0], [1], [0, 0, 1, 1], [], []>} : vector<8x32xf32>, vector<32x32xf32>, vector<8x32xf32> -> vector<8x32xf32>
      %300 = vector.broadcast %15 : vector<1x32xf32> to vector<8x32xf32>
      %301 = arith.addf %299, %300 : vector<8x32xf32>
      %302 = math.absf %301 : vector<8x32xf32>
      %cst_102 = arith.constant -2.000000e+00 : f32
      %303 = vector.broadcast %cst_102 : f32 to vector<8x32xf32>
      %304 = arith.mulf %303, %302 : vector<8x32xf32>
      %305 = math.exp %304 : vector<8x32xf32>
      %cst_103 = arith.constant 1.000000e+00 : f32
      %306 = vector.broadcast %cst_103 : f32 to vector<8x32xf32>
      %307 = arith.subf %306, %305 : vector<8x32xf32>
      %cst_104 = arith.constant 1.000000e+00 : f32
      %308 = vector.broadcast %cst_104 : f32 to vector<8x32xf32>
      %309 = arith.addf %308, %305 : vector<8x32xf32>
      %310 = arith.divf %307, %309 : vector<8x32xf32>
      %cst_105 = arith.constant 0.000000e+00 : f32
      %311 = vector.broadcast %cst_105 : f32 to vector<8x32xf32>
      %312 = arith.cmpf olt, %301, %311 : vector<8x32xf32>
      %cst_106 = arith.constant 0.000000e+00 : f32
      %313 = vector.broadcast %cst_106 : f32 to vector<8x32xf32>
      %314 = arith.subf %313, %310 : vector<8x32xf32>
      %315 = arith.select %312, %314, %310 : vector<8x32xi1>, vector<8x32xf32>
      %316 = vector.broadcast %16 : vector<1x32xf32> to vector<8x32xf32>
      %317 = arith.mulf %315, %316 : vector<8x32xf32>
      %cst_107 = arith.constant dense<0.000000e+00> : vector<8x32xf32>
      %318 = tpu.matmul %317, %12, %cst_107 {dimension_numbers = #tpu.dot_dimension_numbers<[1], [0], [0], [1], [0, 0, 1, 1], [], []>} : vector<8x32xf32>, vector<32x32xf32>, vector<8x32xf32> -> vector<8x32xf32>
      %cst_108 = arith.constant 1.000000e+00 : f32
      %319 = vector.broadcast %cst_108 : f32 to vector<8x32xf32>
      %320 = arith.mulf %319, %318 : vector<8x32xf32>
      %321 = vector.broadcast %16 : vector<1x32xf32> to vector<8x32xf32>
      %322 = arith.addf %321, %320 : vector<8x32xf32>
      %323 = arith.mulf %298, %322 : vector<8x32xf32>
      %cst_109 = arith.constant dense<0.000000e+00> : vector<8x5xf32>
      %324 = tpu.matmul %323, %10, %cst_109 {dimension_numbers = #tpu.dot_dimension_numbers<[1], [0], [0], [1], [0, 0, 1, 1], [], []>} : vector<8x32xf32>, vector<32x5xf32>, vector<8x5xf32> -> vector<8x5xf32>
      %cst_110 = arith.constant dense<0.000000e+00> : vector<8x5xf32>
      %325 = tpu.matmul %275, %18, %cst_110 {dimension_numbers = #tpu.dot_dimension_numbers<[1], [0], [0], [1], [0, 0, 1, 1], [], []>} : vector<8x4xf32>, vector<4x5xf32>, vector<8x5xf32> -> vector<8x5xf32>
      %326 = arith.addf %324, %325 : vector<8x5xf32>
      %327 = vector.broadcast %276 : f32 to vector<1x5xf32>
      %328 = arith.mulf %327, %19 : vector<1x5xf32>
      %329 = vector.broadcast %328 : vector<1x5xf32> to vector<8x5xf32>
      %330 = arith.addf %326, %329 : vector<8x5xf32>
      %331 = vector.broadcast %20 : vector<1x5xf32> to vector<8x5xf32>
      %332 = arith.addf %330, %331 : vector<8x5xf32>
      %333 = arith.mulf %298, %298 : vector<8x32xf32>
      %cst_111 = arith.constant 1.000000e+00 : f32
      %334 = vector.broadcast %cst_111 : f32 to vector<8x32xf32>
      %335 = arith.subf %334, %333 : vector<8x32xf32>
      %336 = arith.mulf %335, %322 : vector<8x32xf32>
      %337 = vector.broadcast %21 : vector<1x32xf32> to vector<8x32xf32>
      %338 = arith.mulf %336, %337 : vector<8x32xf32>
      %cst_112 = arith.constant dense<0.000000e+00> : vector<8xf32>
      %339 = vector.multi_reduction <add>, %338, %cst_112 [1] : vector<8x32xf32> to vector<8xf32>
      %340 = vector.shape_cast %339 : vector<8xf32> to vector<8x1xf32>
      %341 = vector.extract_strided_slice %2 {offsets = [0, 0], sizes = [1, 32], strides = [1, 1]} : vector<4x32xf32> to vector<1x32xf32>
      %342 = vector.broadcast %341 : vector<1x32xf32> to vector<8x32xf32>
      %343 = arith.mulf %298, %342 : vector<8x32xf32>
      %344 = vector.extract_strided_slice %2 {offsets = [1, 0], sizes = [1, 32], strides = [1, 1]} : vector<4x32xf32> to vector<1x32xf32>
      %345 = vector.broadcast %344 : vector<1x32xf32> to vector<8x32xf32>
      %346 = arith.mulf %298, %345 : vector<8x32xf32>
      %347 = vector.extract_strided_slice %2 {offsets = [2, 0], sizes = [1, 32], strides = [1, 1]} : vector<4x32xf32> to vector<1x32xf32>
      %348 = vector.broadcast %347 : vector<1x32xf32> to vector<8x32xf32>
      %349 = arith.mulf %298, %348 : vector<8x32xf32>
      %350 = vector.extract_strided_slice %2 {offsets = [3, 0], sizes = [1, 32], strides = [1, 1]} : vector<4x32xf32> to vector<1x32xf32>
      %351 = vector.broadcast %350 : vector<1x32xf32> to vector<8x32xf32>
      %352 = arith.mulf %298, %351 : vector<8x32xf32>
      %353 = tpu.concatenate %343, %346, %349, %352 in 0 : vector<8x32xf32>, vector<8x32xf32>, vector<8x32xf32>, vector<8x32xf32> -> vector<32x32xf32>
      %354 = arith.mulf %315, %315 : vector<8x32xf32>
      %cst_113 = arith.constant 1.000000e+00 : f32
      %355 = vector.broadcast %cst_113 : f32 to vector<8x32xf32>
      %356 = arith.subf %355, %354 : vector<8x32xf32>
      %357 = vector.broadcast %16 : vector<1x32xf32> to vector<8x32xf32>
      %358 = arith.mulf %356, %357 : vector<8x32xf32>
      %cst_114 = arith.constant dense<0.000000e+00> : vector<32x32xf32>
      %359 = tpu.matmul %353, %13, %cst_114 {dimension_numbers = #tpu.dot_dimension_numbers<[1], [0], [0], [1], [0, 0, 1, 1], [], []>} : vector<32x32xf32>, vector<32x32xf32>, vector<32x32xf32> -> vector<32x32xf32>
      %360 = vector.extract_strided_slice %359 {offsets = [0, 0], sizes = [8, 32], strides = [1, 1]} : vector<32x32xf32> to vector<8x32xf32>
      %361 = vector.extract_strided_slice %359 {offsets = [0, 0], sizes = [8, 32], strides = [1, 1]} : vector<32x32xf32> to vector<8x32xf32>
      %362 = arith.mulf %360, %361 : vector<8x32xf32>
      %363 = vector.extract_strided_slice %359 {offsets = [8, 0], sizes = [8, 32], strides = [1, 1]} : vector<32x32xf32> to vector<8x32xf32>
      %364 = arith.mulf %363, %363 : vector<8x32xf32>
      %365 = arith.addf %362, %364 : vector<8x32xf32>
      %366 = vector.extract_strided_slice %359 {offsets = [16, 0], sizes = [8, 32], strides = [1, 1]} : vector<32x32xf32> to vector<8x32xf32>
      %367 = arith.mulf %366, %366 : vector<8x32xf32>
      %368 = arith.addf %365, %367 : vector<8x32xf32>
      %369 = vector.extract_strided_slice %359 {offsets = [24, 0], sizes = [8, 32], strides = [1, 1]} : vector<32x32xf32> to vector<8x32xf32>
      %370 = arith.mulf %369, %369 : vector<8x32xf32>
      %371 = arith.addf %368, %370 : vector<8x32xf32>
      %372 = arith.mulf %358, %371 : vector<8x32xf32>
      %cst_115 = arith.constant dense<0.000000e+00> : vector<8xf32>
      %373 = vector.multi_reduction <add>, %372, %cst_115 [1] : vector<8x32xf32> to vector<8xf32>
      %374 = vector.shape_cast %373 : vector<8xf32> to vector<8x1xf32>
      %cst_116 = arith.constant 1.000000e+00 : f32
      %375 = vector.broadcast %cst_116 : f32 to vector<8x1xf32>
      %376 = arith.mulf %375, %374 : vector<8x1xf32>
      %377 = arith.addf %340, %376 : vector<8x1xf32>
      %378 = vector.broadcast %22 : vector<1x1xf32> to vector<8x1xf32>
      %379 = arith.addf %377, %378 : vector<8x1xf32>
      %380 = vector.extract_strided_slice %332 {offsets = [0, 0], sizes = [8, 4], strides = [1, 1]} : vector<8x5xf32> to vector<8x4xf32>
      %cst_117 = arith.constant 0.000000e+00 : f32
      %381 = vector.broadcast %cst_117 : f32 to vector<8x4xf32>
      %382 = arith.subf %381, %380 : vector<8x4xf32>
      %cst_118 = arith.constant 0.000000e+00 : f32
      %383 = vector.broadcast %cst_118 : f32 to vector<8x1xf32>
      %384 = arith.subf %383, %379 : vector<8x1xf32>
      %cst_119 = arith.constant 1.250000e-01 : f32
      %385 = vector.broadcast %cst_119 : f32 to vector<8x4xf32>
      %386 = arith.mulf %385, %382 : vector<8x4xf32>
      %cst_120 = arith.constant 1.250000e-01 : f32
      %387 = vector.broadcast %cst_120 : f32 to vector<8x1xf32>
      %388 = arith.mulf %387, %384 : vector<8x1xf32>
      %cst_121 = arith.constant 0.333333343 : f32
      %389 = vector.broadcast %cst_121 : f32 to vector<8x4xf32>
      %390 = arith.mulf %389, %386 : vector<8x4xf32>
      %391 = arith.addf %269, %390 : vector<8x4xf32>
      %cst_122 = arith.constant 0.333333343 : f32
      %392 = vector.broadcast %cst_122 : f32 to vector<8x1xf32>
      %393 = arith.mulf %392, %388 : vector<8x1xf32>
      %394 = arith.addf %272, %393 : vector<8x1xf32>
      %395 = arith.addf %arg15, %386 : vector<8x4xf32>
      %cst_123 = arith.constant 1.250000e-01 : f32
      %396 = arith.addf %32, %cst_123 : f32
      %cst_124 = arith.constant dense<0.000000e+00> : vector<8x32xf32>
      %397 = tpu.matmul %395, %2, %cst_124 {dimension_numbers = #tpu.dot_dimension_numbers<[1], [0], [0], [1], [0, 0, 1, 1], [], []>} : vector<8x4xf32>, vector<4x32xf32>, vector<8x32xf32> -> vector<8x32xf32>
      %398 = vector.broadcast %396 : f32 to vector<1x32xf32>
      %399 = arith.mulf %398, %3 : vector<1x32xf32>
      %400 = vector.broadcast %399 : vector<1x32xf32> to vector<8x32xf32>
      %401 = arith.addf %397, %400 : vector<8x32xf32>
      %402 = arith.addf %401, %9 : vector<8x32xf32>
      %403 = math.absf %402 : vector<8x32xf32>
      %cst_125 = arith.constant -2.000000e+00 : f32
      %404 = vector.broadcast %cst_125 : f32 to vector<8x32xf32>
      %405 = arith.mulf %404, %403 : vector<8x32xf32>
      %406 = math.exp %405 : vector<8x32xf32>
      %407 = math.log1p %406 : vector<8x32xf32>
      %408 = arith.addf %403, %407 : vector<8x32xf32>
      %cst_126 = arith.constant 1.000000e+00 : f32
      %409 = vector.broadcast %cst_126 : f32 to vector<8x32xf32>
      %410 = arith.subf %409, %406 : vector<8x32xf32>
      %cst_127 = arith.constant 1.000000e+00 : f32
      %411 = vector.broadcast %cst_127 : f32 to vector<8x32xf32>
      %412 = arith.addf %411, %406 : vector<8x32xf32>
      %413 = arith.divf %410, %412 : vector<8x32xf32>
      %cst_128 = arith.constant 0.000000e+00 : f32
      %414 = vector.broadcast %cst_128 : f32 to vector<8x32xf32>
      %415 = arith.cmpf olt, %402, %414 : vector<8x32xf32>
      %cst_129 = arith.constant 0.000000e+00 : f32
      %416 = vector.broadcast %cst_129 : f32 to vector<8x32xf32>
      %417 = arith.subf %416, %413 : vector<8x32xf32>
      %418 = arith.select %415, %417, %413 : vector<8x32xi1>, vector<8x32xf32>
      %cst_130 = arith.constant dense<0.000000e+00> : vector<8x32xf32>
      %419 = tpu.matmul %408, %13, %cst_130 {dimension_numbers = #tpu.dot_dimension_numbers<[1], [0], [0], [1], [0, 0, 1, 1], [], []>} : vector<8x32xf32>, vector<32x32xf32>, vector<8x32xf32> -> vector<8x32xf32>
      %420 = vector.broadcast %15 : vector<1x32xf32> to vector<8x32xf32>
      %421 = arith.addf %419, %420 : vector<8x32xf32>
      %422 = math.absf %421 : vector<8x32xf32>
      %cst_131 = arith.constant -2.000000e+00 : f32
      %423 = vector.broadcast %cst_131 : f32 to vector<8x32xf32>
      %424 = arith.mulf %423, %422 : vector<8x32xf32>
      %425 = math.exp %424 : vector<8x32xf32>
      %cst_132 = arith.constant 1.000000e+00 : f32
      %426 = vector.broadcast %cst_132 : f32 to vector<8x32xf32>
      %427 = arith.subf %426, %425 : vector<8x32xf32>
      %cst_133 = arith.constant 1.000000e+00 : f32
      %428 = vector.broadcast %cst_133 : f32 to vector<8x32xf32>
      %429 = arith.addf %428, %425 : vector<8x32xf32>
      %430 = arith.divf %427, %429 : vector<8x32xf32>
      %cst_134 = arith.constant 0.000000e+00 : f32
      %431 = vector.broadcast %cst_134 : f32 to vector<8x32xf32>
      %432 = arith.cmpf olt, %421, %431 : vector<8x32xf32>
      %cst_135 = arith.constant 0.000000e+00 : f32
      %433 = vector.broadcast %cst_135 : f32 to vector<8x32xf32>
      %434 = arith.subf %433, %430 : vector<8x32xf32>
      %435 = arith.select %432, %434, %430 : vector<8x32xi1>, vector<8x32xf32>
      %436 = vector.broadcast %16 : vector<1x32xf32> to vector<8x32xf32>
      %437 = arith.mulf %435, %436 : vector<8x32xf32>
      %cst_136 = arith.constant dense<0.000000e+00> : vector<8x32xf32>
      %438 = tpu.matmul %437, %12, %cst_136 {dimension_numbers = #tpu.dot_dimension_numbers<[1], [0], [0], [1], [0, 0, 1, 1], [], []>} : vector<8x32xf32>, vector<32x32xf32>, vector<8x32xf32> -> vector<8x32xf32>
      %cst_137 = arith.constant 1.000000e+00 : f32
      %439 = vector.broadcast %cst_137 : f32 to vector<8x32xf32>
      %440 = arith.mulf %439, %438 : vector<8x32xf32>
      %441 = vector.broadcast %16 : vector<1x32xf32> to vector<8x32xf32>
      %442 = arith.addf %441, %440 : vector<8x32xf32>
      %443 = arith.mulf %418, %442 : vector<8x32xf32>
      %cst_138 = arith.constant dense<0.000000e+00> : vector<8x5xf32>
      %444 = tpu.matmul %443, %10, %cst_138 {dimension_numbers = #tpu.dot_dimension_numbers<[1], [0], [0], [1], [0, 0, 1, 1], [], []>} : vector<8x32xf32>, vector<32x5xf32>, vector<8x5xf32> -> vector<8x5xf32>
      %cst_139 = arith.constant dense<0.000000e+00> : vector<8x5xf32>
      %445 = tpu.matmul %395, %18, %cst_139 {dimension_numbers = #tpu.dot_dimension_numbers<[1], [0], [0], [1], [0, 0, 1, 1], [], []>} : vector<8x4xf32>, vector<4x5xf32>, vector<8x5xf32> -> vector<8x5xf32>
      %446 = arith.addf %444, %445 : vector<8x5xf32>
      %447 = vector.broadcast %396 : f32 to vector<1x5xf32>
      %448 = arith.mulf %447, %19 : vector<1x5xf32>
      %449 = vector.broadcast %448 : vector<1x5xf32> to vector<8x5xf32>
      %450 = arith.addf %446, %449 : vector<8x5xf32>
      %451 = vector.broadcast %20 : vector<1x5xf32> to vector<8x5xf32>
      %452 = arith.addf %450, %451 : vector<8x5xf32>
      %453 = arith.mulf %418, %418 : vector<8x32xf32>
      %cst_140 = arith.constant 1.000000e+00 : f32
      %454 = vector.broadcast %cst_140 : f32 to vector<8x32xf32>
      %455 = arith.subf %454, %453 : vector<8x32xf32>
      %456 = arith.mulf %455, %442 : vector<8x32xf32>
      %457 = vector.broadcast %21 : vector<1x32xf32> to vector<8x32xf32>
      %458 = arith.mulf %456, %457 : vector<8x32xf32>
      %cst_141 = arith.constant dense<0.000000e+00> : vector<8xf32>
      %459 = vector.multi_reduction <add>, %458, %cst_141 [1] : vector<8x32xf32> to vector<8xf32>
      %460 = vector.shape_cast %459 : vector<8xf32> to vector<8x1xf32>
      %461 = vector.extract_strided_slice %2 {offsets = [0, 0], sizes = [1, 32], strides = [1, 1]} : vector<4x32xf32> to vector<1x32xf32>
      %462 = vector.broadcast %461 : vector<1x32xf32> to vector<8x32xf32>
      %463 = arith.mulf %418, %462 : vector<8x32xf32>
      %464 = vector.extract_strided_slice %2 {offsets = [1, 0], sizes = [1, 32], strides = [1, 1]} : vector<4x32xf32> to vector<1x32xf32>
      %465 = vector.broadcast %464 : vector<1x32xf32> to vector<8x32xf32>
      %466 = arith.mulf %418, %465 : vector<8x32xf32>
      %467 = vector.extract_strided_slice %2 {offsets = [2, 0], sizes = [1, 32], strides = [1, 1]} : vector<4x32xf32> to vector<1x32xf32>
      %468 = vector.broadcast %467 : vector<1x32xf32> to vector<8x32xf32>
      %469 = arith.mulf %418, %468 : vector<8x32xf32>
      %470 = vector.extract_strided_slice %2 {offsets = [3, 0], sizes = [1, 32], strides = [1, 1]} : vector<4x32xf32> to vector<1x32xf32>
      %471 = vector.broadcast %470 : vector<1x32xf32> to vector<8x32xf32>
      %472 = arith.mulf %418, %471 : vector<8x32xf32>
      %473 = tpu.concatenate %463, %466, %469, %472 in 0 : vector<8x32xf32>, vector<8x32xf32>, vector<8x32xf32>, vector<8x32xf32> -> vector<32x32xf32>
      %474 = arith.mulf %435, %435 : vector<8x32xf32>
      %cst_142 = arith.constant 1.000000e+00 : f32
      %475 = vector.broadcast %cst_142 : f32 to vector<8x32xf32>
      %476 = arith.subf %475, %474 : vector<8x32xf32>
      %477 = vector.broadcast %16 : vector<1x32xf32> to vector<8x32xf32>
      %478 = arith.mulf %476, %477 : vector<8x32xf32>
      %cst_143 = arith.constant dense<0.000000e+00> : vector<32x32xf32>
      %479 = tpu.matmul %473, %13, %cst_143 {dimension_numbers = #tpu.dot_dimension_numbers<[1], [0], [0], [1], [0, 0, 1, 1], [], []>} : vector<32x32xf32>, vector<32x32xf32>, vector<32x32xf32> -> vector<32x32xf32>
      %480 = vector.extract_strided_slice %479 {offsets = [0, 0], sizes = [8, 32], strides = [1, 1]} : vector<32x32xf32> to vector<8x32xf32>
      %481 = vector.extract_strided_slice %479 {offsets = [0, 0], sizes = [8, 32], strides = [1, 1]} : vector<32x32xf32> to vector<8x32xf32>
      %482 = arith.mulf %480, %481 : vector<8x32xf32>
      %483 = vector.extract_strided_slice %479 {offsets = [8, 0], sizes = [8, 32], strides = [1, 1]} : vector<32x32xf32> to vector<8x32xf32>
      %484 = arith.mulf %483, %483 : vector<8x32xf32>
      %485 = arith.addf %482, %484 : vector<8x32xf32>
      %486 = vector.extract_strided_slice %479 {offsets = [16, 0], sizes = [8, 32], strides = [1, 1]} : vector<32x32xf32> to vector<8x32xf32>
      %487 = arith.mulf %486, %486 : vector<8x32xf32>
      %488 = arith.addf %485, %487 : vector<8x32xf32>
      %489 = vector.extract_strided_slice %479 {offsets = [24, 0], sizes = [8, 32], strides = [1, 1]} : vector<32x32xf32> to vector<8x32xf32>
      %490 = arith.mulf %489, %489 : vector<8x32xf32>
      %491 = arith.addf %488, %490 : vector<8x32xf32>
      %492 = arith.mulf %478, %491 : vector<8x32xf32>
      %cst_144 = arith.constant dense<0.000000e+00> : vector<8xf32>
      %493 = vector.multi_reduction <add>, %492, %cst_144 [1] : vector<8x32xf32> to vector<8xf32>
      %494 = vector.shape_cast %493 : vector<8xf32> to vector<8x1xf32>
      %cst_145 = arith.constant 1.000000e+00 : f32
      %495 = vector.broadcast %cst_145 : f32 to vector<8x1xf32>
      %496 = arith.mulf %495, %494 : vector<8x1xf32>
      %497 = arith.addf %460, %496 : vector<8x1xf32>
      %498 = vector.broadcast %22 : vector<1x1xf32> to vector<8x1xf32>
      %499 = arith.addf %497, %498 : vector<8x1xf32>
      %500 = vector.extract_strided_slice %452 {offsets = [0, 0], sizes = [8, 4], strides = [1, 1]} : vector<8x5xf32> to vector<8x4xf32>
      %cst_146 = arith.constant 0.000000e+00 : f32
      %501 = vector.broadcast %cst_146 : f32 to vector<8x4xf32>
      %502 = arith.subf %501, %500 : vector<8x4xf32>
      %cst_147 = arith.constant 0.000000e+00 : f32
      %503 = vector.broadcast %cst_147 : f32 to vector<8x1xf32>
      %504 = arith.subf %503, %499 : vector<8x1xf32>
      %cst_148 = arith.constant 1.250000e-01 : f32
      %505 = vector.broadcast %cst_148 : f32 to vector<8x4xf32>
      %506 = arith.mulf %505, %502 : vector<8x4xf32>
      %cst_149 = arith.constant 1.250000e-01 : f32
      %507 = vector.broadcast %cst_149 : f32 to vector<8x1xf32>
      %508 = arith.mulf %507, %504 : vector<8x1xf32>
      %cst_150 = arith.constant 0.166666672 : f32
      %509 = vector.broadcast %cst_150 : f32 to vector<8x4xf32>
      %510 = arith.mulf %509, %506 : vector<8x4xf32>
      %511 = arith.addf %391, %510 : vector<8x4xf32>
      %cst_151 = arith.constant 0.166666672 : f32
      %512 = vector.broadcast %cst_151 : f32 to vector<8x1xf32>
      %513 = arith.mulf %512, %508 : vector<8x1xf32>
      %514 = arith.addf %394, %513 : vector<8x1xf32>
      scf.yield %511, %514 : vector<8x4xf32>, vector<8x1xf32>
    }
    %c8_i32_26 = arith.constant 8 : i32
    %cst_27 = arith.constant 0.000000e+00 : f32
    %26 = vector.broadcast %cst_27 : f32 to vector<8x128xf32>
    %c0_28 = arith.constant 0 : index
    %c0_29 = arith.constant 0 : index
    %27 = vector.load %arg13[%c0_28, %c0_29] : memref<8x128xf32, #tpu.memory_space<vmem>>, vector<8x128xf32>
    tpu.vector_store %arg13[%c0_28, %c0_29], %26 {strides = array<i32>} : memref<8x128xf32, #tpu.memory_space<vmem>>, vector<8x128xf32>,
    %c0_30 = arith.constant 0 : index
    %c0_31 = arith.constant 0 : index
    %28 = vector.load %arg13[%c0_30, %c0_31] : memref<8x128xf32, #tpu.memory_space<vmem>>, vector<8x4xf32>
    tpu.vector_store %arg13[%c0_30, %c0_31], %25#0 {strides = array<i32>} : memref<8x128xf32, #tpu.memory_space<vmem>>, vector<8x4xf32>,
    %c0_32 = arith.constant 0 : index
    %c4 = arith.constant 4 : index
    %29 = vector.load %arg13[%c0_32, %c4] : memref<8x128xf32, #tpu.memory_space<vmem>>, vector<8x1xf32>
    tpu.vector_store %arg13[%c0_32, %c4], %25#1 {strides = array<i32>} : memref<8x128xf32, #tpu.memory_space<vmem>>, vector<8x1xf32>,
    return
  }
  func.func @transform_0(%arg0: i32) -> (i32, i32) {
    %c0_i32 = arith.constant 0 : i32
    %c0_i32_0 = arith.constant 0 : i32
    return %arg0, %c0_i32 : i32, i32
  }
  func.func @transform_1(%arg0: i32) -> (i32, i32) {
    %c0_i32 = arith.constant 0 : i32
    %c0_i32_0 = arith.constant 0 : i32
    return %arg0, %c0_i32 : i32, i32
  }
  func.func @transform_2(%arg0: i32) -> (i32, i32) {
    %c0_i32 = arith.constant 0 : i32
    %c0_i32_0 = arith.constant 0 : i32
    %c0_i32_1 = arith.constant 0 : i32
    return %c0_i32, %c0_i32_0 : i32, i32
  }
  func.func @transform_3(%arg0: i32) -> (i32, i32) {
    %c0_i32 = arith.constant 0 : i32
    %c0_i32_0 = arith.constant 0 : i32
    %c0_i32_1 = arith.constant 0 : i32
    return %c0_i32, %c0_i32_0 : i32, i32
  }
  func.func @transform_4(%arg0: i32) -> (i32, i32) {
    %c0_i32 = arith.constant 0 : i32
    %c0_i32_0 = arith.constant 0 : i32
    %c0_i32_1 = arith.constant 0 : i32
    return %c0_i32, %c0_i32_0 : i32, i32
  }
  func.func @transform_5(%arg0: i32) -> (i32, i32, i32) {
    %c0_i32 = arith.constant 0 : i32
    %c0_i32_0 = arith.constant 0 : i32
    %c0_i32_1 = arith.constant 0 : i32
    %c0_i32_2 = arith.constant 0 : i32
    return %c0_i32, %c0_i32_0, %c0_i32_1 : i32, i32, i32
  }
  func.func @transform_6(%arg0: i32) -> (i32, i32, i32) {
    %c0_i32 = arith.constant 0 : i32
    %c0_i32_0 = arith.constant 0 : i32
    %c0_i32_1 = arith.constant 0 : i32
    %c0_i32_2 = arith.constant 0 : i32
    return %c0_i32, %c0_i32_0, %c0_i32_1 : i32, i32, i32
  }
  func.func @transform_7(%arg0: i32) -> (i32, i32) {
    %c0_i32 = arith.constant 0 : i32
    %c0_i32_0 = arith.constant 0 : i32
    %c0_i32_1 = arith.constant 0 : i32
    return %c0_i32, %c0_i32_0 : i32, i32
  }
  func.func @transform_8(%arg0: i32) -> (i32, i32) {
    %c0_i32 = arith.constant 0 : i32
    %c0_i32_0 = arith.constant 0 : i32
    %c0_i32_1 = arith.constant 0 : i32
    return %c0_i32, %c0_i32_0 : i32, i32
  }
  func.func @transform_9(%arg0: i32) -> (i32, i32) {
    %c0_i32 = arith.constant 0 : i32
    %c0_i32_0 = arith.constant 0 : i32
    %c0_i32_1 = arith.constant 0 : i32
    return %c0_i32, %c0_i32_0 : i32, i32
  }
  func.func @transform_10(%arg0: i32) -> (i32, i32) {
    %c0_i32 = arith.constant 0 : i32
    %c0_i32_0 = arith.constant 0 : i32
    %c0_i32_1 = arith.constant 0 : i32
    return %c0_i32, %c0_i32_0 : i32, i32
  }
  func.func @transform_11(%arg0: i32) -> (i32, i32) {
    %c0_i32 = arith.constant 0 : i32
    %c0_i32_0 = arith.constant 0 : i32
    %c0_i32_1 = arith.constant 0 : i32
    return %c0_i32, %c0_i32_0 : i32, i32
  }
  func.func @transform_12(%arg0: i32) -> (i32, i32) {
    %c0_i32 = arith.constant 0 : i32
    %c0_i32_0 = arith.constant 0 : i32
    return %arg0, %c0_i32 : i32, i32
  }
}

</mosaic_0001>

<bundles_post_ra>
// kernel: tpu_custom_call.1
= control target key start
LH: loop header
LB: loop body
LE: loop exit
PB: predicated region body
PF: predicated region fallthrough
CT: control target
= control target key end

     0   :  { %s1943_s0 = inlined_call_operand.vmem [shape: f32[8,4], index: 0, kind: input, shape index: {}]   ;;  %s1944_s1 = inlined_call_operand.vmem [shape: f32[8,8], index: 1, kind: input, shape index: {}]   ;;  %s1945_s2 = inlined_call_operand.hbm [shape: f32[13,32], index: 2, kind: input, shape index: {}]   ;;  %s1946_s3 = inlined_call_operand.vmem [shape: f32[32,5], index: 3, kind: input, shape index: {}]   ;;  %s1947_s4 = inlined_call_operand.vmem [shape: f32[1,32], index: 4, kind: input, shape index: {}]   ;;  %s1948_s5 = inlined_call_operand.vmem [shape: f32[1,32,32], index: 5, kind: input, shape index: {}]   ;;  %s1949_s6 = inlined_call_operand.vmem [shape: f32[1,1,32], index: 6, kind: input, shape index: {}]   ;;  %s1950_s7 = inlined_call_operand.vmem [shape: f32[1,32], index: 7, kind: input, shape index: {}]   ;;  %s1951_s8 = inlined_call_operand.vmem [shape: f32[5,5], index: 8, kind: input, shape index: {}]   ;;  %s1952_s9 = inlined_call_operand.vmem [shape: f32[1,5], index: 9, kind: input, shape index: {}]   ;;  %s1953_s10 = inlined_call_operand.vmem [shape: f32[1,32], index: 10, kind: input, shape index: {}]   ;;  %s1954_s11 = inlined_call_operand.<no memory space> [shape: f32[1,1], index: 11, kind: input, shape index: {}]   ;;  %s1955_s12 = inlined_call_operand.hbm [shape: f32[8,128], index: 12, kind: output, shape index: {}]  }
   0x1   :  { %v17_v0 = vstv %s1954_s11 }
   0x2   :  { %18 = vst [vmem:[#allocation2] sm:$0x1] %v17_v0 }
   0x3   :  { %19 = vsyncpa [#allocation4], 0 }
   0x4   :  { %20 = vsyncpa [#allocation5], 0  ;;  %s29_s25 = sshll.u32 %s1945_s2, 4  ;;  %s1454_s26 = smov [#allocation3]   ;;  %s30_s25 = int_to_ptr.hbm [resolvable:$true] %s29_s25 }
   0x5   :  { %s31_s27 = sshll.u32 %s1454_s26, 4  ;;  %s1455_s28 = smov 128   ;;  %s32_s27 = int_to_ptr.vmem [resolvable:$true] %s31_s27 }
   0x6   :  { %s1456_s29 = smov 8  }
   0x7   :  { %37 = dma.hbm_to_vmem [thread:$0]  %s30_s25, 256, %s32_s27, [#allocation4], %s1455_s28, %s1455_s28, %s1456_s29  }
   0x8   :  { %1438 = dma.done.wait [#allocation4], 256  }
   0x9   :  { %1439 = vsyncadd [#allocation4], 4294967040  ;;  %v60_v1 = vld [vmem:[%s1943_s0] sm:$0xff]   ;;  %v1542_v3 = vld [vmem:[%s1946_s3 + $0x8] sm:$0xff]  ;;  %vm70_vm0 = vcmask 1042432   ;;  %vm75_vm1 = vcmask 64512  }
   0xa   :  { %v1537_v2 = vld [vmem:[%s1946_s3] sm:$0xff]  ;;  %v1547_v4 = vld [vmem:[%s1946_s3 + $0x10] sm:$0xff]  ;;  %v1552_v5 = vld [vmem:[%s1946_s3 + $0x18] sm:$0xff]  ;;  %v1612_v25 = vmov 0.0  }
   0xb   :  { %v1557_v6 = vld [vmem:[%s1948_s5] sm:$0xff]  ;;  %v1562_v7 = vld [vmem:[%s1948_s5 + $0x8] sm:$0xff]  ;;  %v1567_v8 = vld [vmem:[%s1948_s5 + $0x10] sm:$0xff] }
   0xc   :  { %v1572_v9 = vld [vmem:[%s1948_s5 + $0x18] sm:$0xff]  ;;  %v1577_v10 = vld [vmem:[%s1949_s6] sm:$0x1]  ;;  %v1601_v16 = vld [vmem:[#allocation3] sm:$0xff] }
   0xd   :  { %v1582_v11 = vld [vmem:[%s1950_s7] sm:$0x1]  ;;  %v62_v17 = vld [vmem:[#allocation3 + $0x8] sm:$0x1f]  ;;  %v71_v18 = vrot.slane %v1601_v16, 5 }
   0xe   :  { %v1587_v12 = vld [vmem:[%s1951_s8] sm:$0x1f]  ;;  %v72_v19 = vrot.slane %v62_v17, 5 }
   0xf   :  { %v1592_v13 = vld [vmem:[%s1952_s9] sm:$0x1] }
  0x10   :  { %v1597_v14 = vld [vmem:[%s1953_s10] sm:$0x1]  ;;  %v73_v21 = vsel %vm70_vm0, %v71_v18, %v72_v19  ;;  %s1616_s10 = smov 0  }
  0x11   :  { %v1599_v15 = vld [vmem:[#allocation2] sm:$0x1]  ;;  %94 = vmatpush.msra.mxu0 %v73_v21 }
  0x12   :  { %v63_v20 = vld [vmem:[%s1944_s1] sm:$0xff] }
  0x13   :  { %1230 = vmatmul.msk.f32.vlgmr.msra.gmra.mxu0 %vm75_vm1, %v63_v20  ;;  %v1337_v22 = vld [vmem:[%s1947_s4] ss:$0 sm:$0xff] }
  0x90   :  { %v96_v23 = vpop.f32.mrf.mxu0 }
  0x91   :  { %v1610_v24 = vadd.f32 %v1337_v22, %v96_v23 }
  0x92 LB: > { %vm131_vm2 = vcmask 1043456   ;;  %vm127_vm3 = vcmask 31744   ;;  %271 = vmatpush.msra.mxu2 %v1572_v9  ;;  %s121_s1 = scvt.s32.f32 %s1452_s10  ;;  %vm192_vm4 = vcmask 261120   ;;  %v1693_v57 = vperm.slane %v1601_v16, 0  ;;  %s118_s10 = sadd.s32 1, %s1452_s10   ;;  %s1452_s10 = sphi %s1616_s10, %s118_s10   ;;  %v1448_v1 = vphi %v60_v1, %v1957_v1   ;;  %v1444_v25 = vphi %v1612_v25, %v1956_v25  }
  0x93   : > { %1231 = vmatpush.msk.msra.mxu0 %vm131_vm2, %v1601_v16  ;;  %1233 = vmatpush.xpose.msk.msra.mxu1 %vm192_vm4, %v1572_v9  ;;  %v1705_v61 = vperm.slane %v1601_v16, 1  ;;  %v1715_v63 = vperm.slane %v1601_v16, 2  ;;  %v1723_v17 = vperm.slane %v1601_v16, 3  ;;  %v1729_v19 = vperm.slane %v1577_v10, 0  ;;  %p115_p0 = scmp.ge.s32.totalorder %s118_s10, 8  }
  0x94   : > { %1232 = vmatmul.msk.f32.vlgmr.msra.gmra.mxu0 %vm127_vm3, %v1448_v1  ;;  %272 = vmatpush.msra.mxu2 %v1567_v8  ;;  %s1650_s4 = smul.f32 0.125, %s121_s1  ;;  %s1457_s17 = smov (%p115_p0), 4  }
  0x95   : > { %1239 = vmatpush.msk.msrb.mxu0 %vm131_vm2, %v1587_v12  ;;  %1242 = vmatpush.xpose.msk.msra.mxu3 %vm192_vm4, %v1572_v9  ;;  %s1459_s18 = smov (%p115_p0), [#allocation6]   ;;  %s1209_s21 = sshll.u32 (%p115_p0), %s1955_s12, 4  ;;  %s1210_s21 = int_to_ptr.hbm [resolvable:$true] %s1209_s21 }
  0x96   : > { %273 = vmatpush.msra.mxu2 %v1562_v7  ;;  %v124_v26 = vstv %s1650_s4  ;;  %s422_s2 = sadd.f32 0.0625, %s1650_s4  ;;  %s1207_s19 = sshll.u32 (%p115_p0), %s1459_s18, 4  ;;  %s1208_s19 = int_to_ptr.vmem [resolvable:$true] %s1207_s19 }
  0x97   : > { %319 = vmatpush.msra.mxu0 %v1552_v5  ;;  %1234 = vmatpush.xpose.msk.msra.mxu1 %vm192_vm4, %v1567_v8  ;;  %v125_v27 = vmul.f32 %v124_v26, %v1601_v16  ;;  %s935_s16 = sadd.f32 0.125, %s1650_s4 }
  0x98   : > { %274 = vmatpush.msra.mxu2 %v1557_v6 }
  0x99   : > { %320 = vmatpush.msra.mxu0 %v1547_v4  ;;  %1243 = vmatpush.xpose.msk.msra.mxu3 %vm192_vm4, %v1567_v8  ;;  %v126_v28 = vperm.slane %v125_v27, 4 }
  0x9a   : > { %1250 = vmatpush.msk.msrb.mxu2 %vm131_vm2, %v1601_v16 }
  0x9b   : > { %321 = vmatpush.msra.mxu0 %v1542_v3  ;;  %1235 = vmatpush.xpose.msk.msra.mxu1 %vm192_vm4, %v1562_v7 }
  0x9c   : > { %1240 = vmatmul.msk.f32.vlgmr.msrb.gmra.mxu0 %vm127_vm3, %v1448_v1 }
  0x9d   : > { %322 = vmatpush.msra.mxu0 %v1537_v2  ;;  %1244 = vmatpush.xpose.msk.msra.mxu3 %vm192_vm4, %v1562_v7 }
  0x9f   : > { %1252 = vmatpush.xpose.msk.msrb.mxu0 %vm192_vm4, %v1572_v9  ;;  %1236 = vmatpush.xpose.msk.msra.mxu1 %vm192_vm4, %v1557_v6 }
  0xa1   : > { %1245 = vmatpush.xpose.msk.msra.mxu3 %vm192_vm4, %v1557_v6 }
  0xa3   : > { %1253 = vmatpush.xpose.msk.msrb.mxu0 %vm192_vm4, %v1567_v8  ;;  %547 = vmatpush.msrb.mxu1 %v1572_v9 }
  0xa5   : > { %1290 = vmatpush.xpose.msk.msrb.mxu3 %vm192_vm4, %v1572_v9  ;;  %548 = vmatpush.msrb.mxu1 %v1567_v8 }
  0xa7   : > { %1254 = vmatpush.xpose.msk.msrb.mxu0 %vm192_vm4, %v1562_v7  ;;  %549 = vmatpush.msrb.mxu1 %v1562_v7 }
  0xa9   : > { %1291 = vmatpush.xpose.msk.msrb.mxu3 %vm192_vm4, %v1567_v8  ;;  %550 = vmatpush.msrb.mxu1 %v1557_v6 }
  0xab   : > { %1255 = vmatpush.xpose.msk.msrb.mxu0 %vm192_vm4, %v1557_v6 }
  0xad   : > { %1292 = vmatpush.xpose.msk.msrb.mxu3 %vm192_vm4, %v1562_v7 }
  0xb1   : > { %1293 = vmatpush.xpose.msk.msrb.mxu3 %vm192_vm4, %v1557_v6 }
 0x111   : > { %v151_v29 = vpop.f32.mrf.mxu0 }
 0x112   : > { %v152_v30 = vadd.f32 %v151_v29, %v126_v28 }
 0x114   : > { %v154_v31 = vadd.f32 %v152_v30, %v1610_v24 }
 0x116   : > { %v155_v32 = vand.u32 2147483647, %v154_v31  ;;  %vm186_vm10 = vcmp.lt.f32.partialorder %v154_v31, 0.0 }
 0x118   : > { %v156_v33 = vmul.f32 -2.0, %v155_v32 }
 0x11a   : > { %v157_v34 = vmul.f32 1.442695, %v156_v33 }
 0x11c   : > { %1338 = vpow2.f32 %v157_v34 }
 0x122   : > { %v1339_v35 = vpop.eup %1338 }
 0x123   : > { %v159_v36 = vadd.f32 1.0, %v1339_v35  ;;  %v162_v37 = vmul.f32 -0.5, %v1339_v35  ;;  %v165_v39 = vand.u32 2147483647, %v1339_v35  ;;  %v169_v53 = vsub.f32 1.0, %v1339_v35 }
 0x125   : > { %1340 = vrcp.f32 %v159_v36  ;;  %v163_v38 = vadd.f32 1.0, %v162_v37  ;;  %vm166_vm5 = vcmp.lt.f32.partialorder %v165_v39, 0.0004427343  ;;  %v182_v46 = vand.u32 2147483648, %v159_v36 }
 0x126   : > { %1342 = vlog2.f32 %v159_v36  ;;  %v180_v49 = vand.u32 2147483647, %v159_v36  ;;  %vm176_vm7 = vweird.f32 %v159_v36 }
 0x127   : > { %v164_v44 = vmul.f32 %v1339_v35, %v163_v38  ;;  %v183_v52 = vor.u32 1.1754944e-38, %v182_v46  ;;  %v1733_v46 = vperm.slane %v1582_v11, 0 }
 0x128   : > { %vm181_vm9 = vcmp.eq.f32.partialorder %v180_v49, 8.507059e+37 }
 0x12b   : > { %v1341_v40 = vpop.eup %1340 }
 0x12c   : > { %v1343_v41 = vpop.eup %1342  ;;  %v172_v42 = vmul.f32 %v1341_v40, %v159_v36  ;;  %vm177_vm6 = vweird.f32 %v1341_v40 }
 0x12d   : > { %v161_v43 = vmul.f32 0.6931472, %v1343_v41  ;;  %vm178_vm8 = vmor %vm176_vm7, %vm177_vm6 }
 0x12e   : > { %v173_v45 = vsub.f32 1.0, %v172_v42 }
 0x12f   : > { %v167_v47 = vsel %vm166_vm5, %v164_v44, %v161_v43 }
 0x130   : > { %v174_v48 = vmul.f32 %v1341_v40, %v173_v45  ;;  %v168_v50 = vadd.f32 %v167_v47, %v155_v32 }
 0x132   : > { %v175_v51 = vadd.f32 %v1341_v40, %v174_v48  ;;  %1237 = vmatmul.msk.f32.vlgmr.msra.gmra.mxu1 %vm192_vm4, %v168_v50 }
 0x133   : > { %592 = vmatpush.msra.mxu1 %v1552_v5 }
 0x134   : > { %v179_v54 = vsel %vm178_vm8, %v1341_v40, %v175_v51 }
 0x135   : > { %v184_v55 = vsel %vm181_vm9, %v183_v52, %v179_v54  ;;  %593 = vmatpush.msra.mxu1 %v1547_v4 }
 0x136   : > { %v185_v56 = vmul.f32 %v184_v55, %v169_v53 }
 0x137   : > { %594 = vmatpush.msra.mxu1 %v1542_v3 }
 0x138   : > { %v187_v58 = vsub.f32 0.0, %v185_v56 }
 0x139   : > { %595 = vmatpush.msra.mxu1 %v1537_v2 }
 0x13a   : > { %v1697_v59 = vsel %vm186_vm10, %v187_v58, %v185_v56 }
 0x13b   : > { %v345_v60 = vmul.f32 %v1693_v57, %v1697_v59  ;;  %v347_v62 = vmul.f32 %v1705_v61, %v1697_v59  ;;  %v349_v0 = vmul.f32 %v1715_v63, %v1697_v59  ;;  %v351_v18 = vmul.f32 %v1723_v17, %v1697_v59 }
 0x13d   : > { %1246 = vmatmul.msk.f32.vlgmr.msra.gmra.mxu3 %vm192_vm4, %v345_v60 }
 0x13e   : > { %1299 = vmatpush.xpose.msk.msra.mxu3 %vm192_vm4, %v1572_v9 }
 0x142   : > { %1300 = vmatpush.xpose.msk.msra.mxu3 %vm192_vm4, %v1567_v8 }
 0x145   : > { %1247 = vmatmul.msk.f32.gmra.mxu3 %vm192_vm4, %v347_v62 }
 0x146   : > { %1301 = vmatpush.xpose.msk.msra.mxu3 %vm192_vm4, %v1562_v7 }
 0x14a   : > { %1302 = vmatpush.xpose.msk.msra.mxu3 %vm192_vm4, %v1557_v6 }
 0x14d   : > { %1248 = vmatmul.msk.f32.gmra.mxu3 %vm192_vm4, %v349_v0 }
 0x155   : > { %1249 = vmatmul.msk.f32.gmra.mxu3 %vm192_vm4, %v351_v18 }
 0x1af   : > { %v225_v20 = vpop.f32.mrf.mxu1 }
 0x1b0   : > { %v226_v21 = vadd.f32 %v225_v20, %v1729_v19  ;;  %v334_v20 = vmul.f32 %v1697_v59, %v1697_v59 }
 0x1b2   : > { %v228_v22 = vand.u32 2147483647, %v226_v21  ;;  %vm249_vm15 = vcmp.lt.f32.partialorder %v226_v21, 0.0 }
 0x1b4   : > { %v229_v23 = vmul.f32 -2.0, %v228_v22 }
 0x1b6   : > { %v230_v27 = vmul.f32 1.442695, %v229_v23  ;;  %v335_v23 = vsub.f32 1.0, %v334_v20 }
 0x1b8   : > { %1344 = vpow2.f32 %v230_v27  ;;  %v1745_v27 = vperm.slane %v1597_v14, 0 }
 0x1be   : > { %v1345_v28 = vpop.eup %1344 }
 0x1bf   : > { %v233_v29 = vadd.f32 1.0, %v1345_v28  ;;  %v232_v40 = vsub.f32 1.0, %v1345_v28 }
 0x1c0   : > { %v384_v30 = vpop.f32.mrf.mxu3 }
 0x1c1   : > { %1346 = vrcp.f32 %v233_v29  ;;  %v245_v35 = vand.u32 2147483648, %v233_v29  ;;  %v243_v37 = vand.u32 2147483647, %v233_v29  ;;  %vm239_vm12 = vweird.f32 %v233_v29 }
 0x1c2   : > { %v396_v48 = vmul.f32 %v384_v30, %v384_v30 }
 0x1c3   : > { %v246_v39 = vor.u32 1.1754944e-38, %v245_v35  ;;  %vm244_vm14 = vcmp.eq.f32.partialorder %v243_v37, 8.507059e+37 }
 0x1c7   : > { %v1347_v31 = vpop.eup %1346 }
 0x1c8   : > { %v235_v32 = vmul.f32 %v1347_v31, %v233_v29  ;;  %v387_v33 = vpop.f32.mrf.mxu3  ;;  %vm240_vm11 = vweird.f32 %v1347_v31 }
 0x1c9   : > { %vm241_vm13 = vmor %vm239_vm12, %vm240_vm11  ;;  %v397_v45 = vmul.f32 %v387_v33, %v387_v33  ;;  %v327_v33 = vmul.f32 %v124_v26, %v1587_v12  ;;  %v1779_v26 = vstv %s422_s2 }
 0x1ca   : > { %v236_v34 = vsub.f32 1.0, %v235_v32  ;;  %v301_v32 = vpop.f32.mrf.mxu0 }
 0x1cb   : > { %v398_v52 = vadd.f32 %v397_v45, %v396_v48 }
 0x1cc   : > { %v237_v36 = vmul.f32 %v1347_v31, %v236_v34  ;;  %v328_v34 = vperm.slane %v327_v33, 4 }
 0x1ce   : > { %v238_v38 = vadd.f32 %v1347_v31, %v237_v36 }
 0x1d0   : > { %v242_v41 = vsel %vm241_vm13, %v1347_v31, %v238_v38  ;;  %v390_v42 = vpop.f32.mrf.mxu3 }
 0x1d1   : > { %v247_v43 = vsel %vm244_vm14, %v246_v39, %v242_v41  ;;  %v399_v49 = vmul.f32 %v390_v42, %v390_v42 }
 0x1d2   : > { %v248_v44 = vmul.f32 %v247_v43, %v232_v40  ;;  %v1783_v43 = vmul.f32 %v1779_v26, %v1601_v16 }
 0x1d3   : > { %v400_v55 = vadd.f32 %v399_v49, %v398_v52 }
 0x1d4   : > { %v250_v47 = vsub.f32 0.0, %v248_v44 }
 0x1d6   : > { %v251_v50 = vsel %vm249_vm15, %v250_v47, %v248_v44  ;;  %v425_v44 = vperm.slane %v1783_v43, 4 }
 0x1d7   : > { %v352_v51 = vmul.f32 %v251_v50, %v251_v50  ;;  %v255_v53 = vmul.f32 %v1733_v46, %v251_v50 }
 0x1d8   : > { %v393_v54 = vpop.f32.mrf.mxu3 }
 0x1d9   : > { %1238 = vmatmul.msk.f32.vlgmr.msra.gmra.mxu2 %vm192_vm4, %v255_v53  ;;  %v401_v56 = vmul.f32 %v393_v54, %v393_v54  ;;  %v353_v58 = vsub.f32 1.0, %v352_v51 }
 0x1da   : > { %1258 = vmatpush.msk.msra.mxu2 %vm131_vm2, %v1587_v12 }
 0x1db   : > { %v402_v60 = vadd.f32 %v401_v56, %v400_v55  ;;  %v354_v62 = vmul.f32 %v353_v58, %v1733_v46 }
 0x1dd   : > { %v403_v0 = vmul.f32 %v402_v60, %v354_v62 }
 0x1df   : > { %v404_v18 = vsel %vm192_vm4, %v403_v0, 0.0 }
 0x1e0   : > { %405 = vadd.xlane.f32.xlu0 %v404_v18 }
 0x25c   : > { %v276_v21 = vpop.f32.mrf.mxu2 }
 0x25d   : > { %v279_v22 = vadd.f32 %v276_v21, %v1733_v46 }
 0x25f   : > { %v280_v28 = vmul.f32 %v279_v22, %v1697_v59  ;;  %v336_v29 = vmul.f32 %v335_v23, %v279_v22  ;;  %v1757_v59 = vperm.slane %v1592_v13, 0 }
 0x261   : > { %1241 = vmatmul.msk.f32.vlgmr.msra.gmra.mxu0 %vm192_vm4, %v280_v28  ;;  %v340_v30 = vmul.f32 %v1745_v27, %v336_v29 }
 0x262   : > { %1269 = vmatpush.msk.msra.mxu0 %vm131_vm2, %v1601_v16 }
 0x263   : > { %v341_v31 = vsel %vm192_vm4, %v340_v30, 0.0 }
 0x264   : > { %342 = vadd.xlane.f32.xlu0 %v341_v31 }
 0x2de   : > { %v324_v35 = vpop.f32.mrf.mxu0 }
 0x2df   : > { %v325_v36 = vadd.f32 %v324_v35, %v301_v32 }
 0x2e1   : > { %v329_v37 = vadd.f32 %v328_v34, %v325_v36 }
 0x2e3   : > { %v333_v38 = vadd.f32 %v1757_v59, %v329_v37 }
 0x2e5   : > { %v412_v39 = vsub.f32 0.0, %v333_v38 }
 0x2e7   : > { %v1760_v40 = vmul.f32 0.125, %v412_v39 }
 0x2e9   : > { %v420_v41 = vmul.f32 0.5, %v1760_v40 }
 0x2eb   : > { %v421_v42 = vadd.f32 %v1448_v1, %v420_v41 }
 0x2ed   : > { %1251 = vmatmul.msk.f32.vlgmr.msrb.gmra.mxu2 %vm127_vm3, %v421_v42 }
 0x2ee   : > { %1261 = vmatpush.xpose.msk.msrb.mxu2 %vm192_vm4, %v1572_v9 }
 0x2f2   : > { %1262 = vmatpush.xpose.msk.msrb.mxu2 %vm192_vm4, %v1567_v8 }
 0x2f5   : > { %1259 = vmatmul.msk.f32.vlgmr.msra.gmra.mxu2 %vm127_vm3, %v421_v42 }
 0x2f6   : > { %1263 = vmatpush.xpose.msk.msrb.mxu2 %vm192_vm4, %v1562_v7 }
 0x2fa   : > { %1264 = vmatpush.xpose.msk.msrb.mxu2 %vm192_vm4, %v1557_v6 }
 0x2fe   : > { %848 = vmatpush.msra.mxu2 %v1552_v5 }
 0x300   : > { %849 = vmatpush.msra.mxu2 %v1547_v4 }
 0x302   : > { %850 = vmatpush.msra.mxu2 %v1542_v3 }
 0x304   : > { %851 = vmatpush.msra.mxu2 %v1537_v2 }
 0x370   : > { %v446_v45 = vpop.f32.mrf.mxu2 }
 0x371   : > { %v447_v47 = vadd.f32 %v446_v45, %v425_v44 }
 0x373   : > { %v449_v48 = vadd.f32 %v447_v47, %v1610_v24 }
 0x375   : > { %v450_v49 = vand.u32 2147483647, %v449_v48  ;;  %vm481_vm8 = vcmp.lt.f32.partialorder %v449_v48, 0.0 }
 0x377   : > { %v451_v50 = vmul.f32 -2.0, %v450_v49 }
 0x379   : > { %v452_v51 = vmul.f32 1.442695, %v451_v50 }
 0x37b   : > { %1348 = vpow2.f32 %v452_v51  ;;  %v1811_v51 = vpop.f32.mrf.mxu2 }
 0x381   : > { %v1349_v52 = vpop.eup %1348 }
 0x382   : > { %v454_v53 = vadd.f32 1.0, %v1349_v52  ;;  %v457_v54 = vmul.f32 -0.5, %v1349_v52  ;;  %v460_v56 = vand.u32 2147483647, %v1349_v52  ;;  %v464_v32 = vsub.f32 1.0, %v1349_v52 }
 0x384   : > { %1350 = vlog2.f32 %v454_v53  ;;  %v458_v55 = vadd.f32 1.0, %v457_v54  ;;  %vm461_vm0 = vcmp.lt.f32.partialorder %v460_v56, 0.0004427343  ;;  %v477_v23 = vand.u32 2147483648, %v454_v53 }
 0x385   : > { %1352 = vrcp.f32 %v454_v53  ;;  %v475_v29 = vand.u32 2147483647, %v454_v53  ;;  %vm471_vm5 = vweird.f32 %v454_v53 }
 0x386   : > { %v459_v0 = vmul.f32 %v1349_v52, %v458_v55  ;;  %v478_v31 = vor.u32 1.1754944e-38, %v477_v23 }
 0x387   : > { %vm476_vm7 = vcmp.eq.f32.partialorder %v475_v29, 8.507059e+37 }
 0x38a   : > { %v1351_v58 = vpop.eup %1350 }
 0x38b   : > { %v1353_v60 = vpop.eup %1352  ;;  %v456_v62 = vmul.f32 0.6931472, %v1351_v58 }
 0x38c   : > { %v467_v18 = vmul.f32 %v1353_v60, %v454_v53  ;;  %vm472_vm1 = vweird.f32 %v1353_v60 }
 0x38d   : > { %v462_v20 = vsel %vm461_vm0, %v459_v0, %v456_v62  ;;  %vm473_vm6 = vmor %vm471_vm5, %vm472_vm1 }
 0x38e   : > { %v463_v21 = vadd.f32 %v462_v20, %v450_v49  ;;  %v468_v22 = vsub.f32 1.0, %v467_v18 }
 0x390   : > { %v469_v28 = vmul.f32 %v1353_v60, %v468_v22  ;;  %1256 = vmatmul.msk.f32.vlgmr.msrb.gmra.mxu0 %vm192_vm4, %v463_v21 }
 0x391   : > { %803 = vmatpush.msrb.mxu0 %v1572_v9 }
 0x392   : > { %v470_v30 = vadd.f32 %v1353_v60, %v469_v28 }
 0x393   : > { %804 = vmatpush.msrb.mxu0 %v1567_v8 }
 0x394   : > { %v474_v33 = vsel %vm473_vm6, %v1353_v60, %v470_v30 }
 0x395   : > { %v479_v34 = vsel %vm476_vm7, %v478_v31, %v474_v33  ;;  %805 = vmatpush.msrb.mxu0 %v1562_v7 }
 0x396   : > { %v480_v35 = vmul.f32 %v479_v34, %v464_v32 }
 0x397   : > { %806 = vmatpush.msrb.mxu0 %v1557_v6 }
 0x398   : > { %v482_v36 = vsub.f32 0.0, %v480_v35 }
 0x39a   : > { %v1794_v37 = vsel %vm481_vm8, %v482_v36, %v480_v35 }
 0x39b   : > { %v611_v38 = vmul.f32 %v1794_v37, %v1693_v57  ;;  %v612_v39 = vmul.f32 %v1794_v37, %v1705_v61  ;;  %v613_v41 = vmul.f32 %v1794_v37, %v1715_v63  ;;  %v614_v42 = vmul.f32 %v1794_v37, %v1723_v17 }
 0x39d   : > { %1265 = vmatmul.msk.f32.vlgmr.msrb.gmra.mxu2 %vm192_vm4, %v611_v38 }
 0x39e   : > { %1296 = vmatpush.msk.msrb.mxu2 %vm131_vm2, %v1587_v12 }
 0x3a5   : > { %1266 = vmatmul.msk.f32.gmra.mxu2 %vm192_vm4, %v612_v39 }
 0x3ad   : > { %1267 = vmatmul.msk.f32.gmra.mxu2 %vm192_vm4, %v613_v41 }
 0x3b5   : > { %1268 = vmatmul.msk.f32.gmra.mxu2 %vm192_vm4, %v614_v42 }
 0x40d   : > { %v504_v45 = vpop.f32.mrf.mxu0 }
 0x40e   : > { %v505_v47 = vadd.f32 %v504_v45, %v1729_v19 }
 0x410   : > { %v507_v48 = vand.u32 2147483647, %v505_v47  ;;  %vm528_vm13 = vcmp.lt.f32.partialorder %v505_v47, 0.0 }
 0x412   : > { %v508_v49 = vmul.f32 -2.0, %v507_v48 }
 0x414   : > { %v509_v50 = vmul.f32 1.442695, %v508_v49 }
 0x416   : > { %1354 = vpow2.f32 %v509_v50 }
 0x41c   : > { %v1355_v52 = vpop.eup %1354 }
 0x41d   : > { %v512_v53 = vadd.f32 1.0, %v1355_v52  ;;  %v511_v22 = vsub.f32 1.0, %v1355_v52 }
 0x41f   : > { %1356 = vrcp.f32 %v512_v53  ;;  %v524_v62 = vand.u32 2147483648, %v512_v53  ;;  %v522_v18 = vand.u32 2147483647, %v512_v53  ;;  %vm518_vm10 = vweird.f32 %v512_v53 }
 0x420   : > { %v647_v54 = vpop.f32.mrf.mxu2 }
 0x421   : > { %v525_v21 = vor.u32 1.1754944e-38, %v524_v62  ;;  %vm523_vm12 = vcmp.eq.f32.partialorder %v522_v18, 8.507059e+37  ;;  %v659_v36 = vmul.f32 %v647_v54, %v647_v54 }
 0x425   : > { %v1357_v55 = vpop.eup %1356 }
 0x426   : > { %v514_v56 = vmul.f32 %v1357_v55, %v512_v53  ;;  %vm519_vm9 = vweird.f32 %v1357_v55  ;;  %v604_v53 = vmul.f32 %v1794_v37, %v1794_v37 }
 0x427   : > { %vm520_vm11 = vmor %vm518_vm10, %vm519_vm9 }
 0x428   : > { %v515_v58 = vsub.f32 1.0, %v514_v56  ;;  %v650_v60 = vpop.f32.mrf.mxu2  ;;  %v605_v56 = vsub.f32 1.0, %v604_v53 }
 0x429   : > { %v660_v32 = vmul.f32 %v650_v60, %v650_v60 }
 0x42a   : > { %v516_v0 = vmul.f32 %v1357_v55, %v515_v58 }
 0x42b   : > { %v661_v39 = vadd.f32 %v660_v32, %v659_v36 }
 0x42c   : > { %v517_v20 = vadd.f32 %v1357_v55, %v516_v0 }
 0x42e   : > { %v521_v23 = vsel %vm520_vm11, %v1357_v55, %v517_v20 }
 0x42f   : > { %v526_v28 = vsel %vm523_vm12, %v525_v21, %v521_v23 }
 0x430   : > { %v527_v29 = vmul.f32 %v526_v28, %v511_v22  ;;  %v653_v30 = vpop.f32.mrf.mxu2  ;;  %v416_v28 = vmul.f32 0.16666667, %v1760_v40 }
 0x431   : > { %v662_v38 = vmul.f32 %v653_v30, %v653_v30 }
 0x432   : > { %v529_v31 = vsub.f32 0.0, %v527_v29 }
 0x433   : > { %v663_v45 = vadd.f32 %v662_v38, %v661_v39 }
 0x434   : > { %v530_v33 = vsel %vm528_vm13, %v529_v31, %v527_v29  ;;  %v417_v31 = vadd.f32 %v1448_v1, %v416_v28 }
 0x435   : > { %v531_v34 = vmul.f32 %v530_v33, %v1733_v46  ;;  %v615_v35 = vmul.f32 %v530_v33, %v530_v33 }
 0x437   : > { %1257 = vmatmul.msk.f32.vlgmr.msrb.gmra.mxu1 %vm192_vm4, %v531_v34  ;;  %v616_v41 = vsub.f32 1.0, %v615_v35 }
 0x438   : > { %v656_v42 = vpop.f32.mrf.mxu2  ;;  %1271 = vmatpush.xpose.msk.msrb.mxu1 %vm192_vm4, %v1572_v9 }
 0x439   : > { %v664_v48 = vmul.f32 %v656_v42, %v656_v42  ;;  %v617_v49 = vmul.f32 %v616_v41, %v1733_v46 }
 0x43b   : > { %v665_v47 = vadd.f32 %v664_v48, %v663_v45 }
 0x43c   : > { %1272 = vmatpush.xpose.msk.msrb.mxu1 %vm192_vm4, %v1567_v8 }
 0x43d   : > { %v666_v50 = vmul.f32 %v665_v47, %v617_v49 }
 0x43f   : > { %v667_v52 = vsel %vm192_vm4, %v666_v50, 0.0 }
 0x440   : > { %668 = vadd.xlane.f32.xlu1 %v667_v52  ;;  %1273 = vmatpush.xpose.msk.msrb.mxu1 %vm192_vm4, %v1562_v7 }
 0x444   : > { %1274 = vmatpush.xpose.msk.msrb.mxu1 %vm192_vm4, %v1557_v6 }
 0x4b4   : > { %v552_v54 = vpop.f32.mrf.mxu1 }
 0x4b5   : > { %v555_v55 = vadd.f32 %v552_v54, %v1733_v46 }
 0x4b7   : > { %v556_v58 = vmul.f32 %v555_v55, %v1794_v37  ;;  %v606_v60 = vmul.f32 %v605_v56, %v555_v55  ;;  %v1842_v37 = vmul.f32 %v1779_v26, %v1587_v12 }
 0x4b9   : > { %1260 = vmatmul.msk.f32.vlgmr.msra.gmra.mxu1 %vm192_vm4, %v556_v58  ;;  %v607_v62 = vmul.f32 %v606_v60, %v1745_v27  ;;  %v601_v18 = vperm.slane %v1842_v37, 4  ;;  %v1903_v37 = vstv %s935_s16 }
 0x4ba   : > { %1280 = vmatpush.xpose.msk.msra.mxu1 %vm192_vm4, %v1572_v9 }
 0x4bb   : > { %v608_v0 = vsel %vm192_vm4, %v607_v62, 0.0 }
 0x4bc   : > { %609 = vadd.xlane.f32.xlu1 %v608_v0 }
 0x4be   : > { %1281 = vmatpush.xpose.msk.msra.mxu1 %vm192_vm4, %v1567_v8 }
 0x4c2   : > { %1282 = vmatpush.xpose.msk.msra.mxu1 %vm192_vm4, %v1562_v7 }
 0x4c6   : > { %1283 = vmatpush.xpose.msk.msra.mxu1 %vm192_vm4, %v1557_v6 }
 0x536   : > { %v597_v20 = vpop.f32.mrf.mxu1 }
 0x537   : > { %v598_v21 = vadd.f32 %v597_v20, %v1811_v51 }
 0x539   : > { %v602_v22 = vadd.f32 %v601_v18, %v598_v21 }
 0x53b   : > { %v603_v23 = vadd.f32 %v602_v22, %v1757_v59 }
 0x53d   : > { %v672_v29 = vsub.f32 0.0, %v603_v23 }
 0x53f   : > { %v674_v30 = vmul.f32 0.125, %v672_v29 }
 0x541   : > { %v676_v32 = vmul.f32 0.33333334, %v674_v30  ;;  %v680_v33 = vmul.f32 0.5, %v674_v30 }
 0x543   : > { %v1851_v26 = vadd.f32 %v676_v32, %v417_v31  ;;  %v1854_v34 = vadd.f32 %v1448_v1, %v680_v33 }
 0x545   : > { %1270 = vmatmul.msk.f32.vlgmr.msra.gmra.mxu0 %vm127_vm3, %v1854_v34 }
 0x546   : > { %1277 = vmatpush.msk.msra.mxu0 %vm131_vm2, %v1587_v12 }
 0x5c2   : > { %v702_v51 = vpop.f32.mrf.mxu0 }
 0x5c3   : > { %v703_v40 = vadd.f32 %v702_v51, %v425_v44 }
 0x5c5   : > { %v705_v35 = vadd.f32 %v703_v40, %v1610_v24 }
 0x5c7   : > { %v706_v36 = vand.u32 2147483647, %v705_v35  ;;  %vm737_vm6 = vcmp.lt.f32.partialorder %v705_v35, 0.0 }
 0x5c9   : > { %v707_v38 = vmul.f32 -2.0, %v706_v36 }
 0x5cb   : > { %v708_v39 = vmul.f32 1.442695, %v707_v38 }
 0x5cd   : > { %1358 = vpow2.f32 %v708_v39 }
 0x5d3   : > { %v1359_v41 = vpop.eup %1358 }
 0x5d4   : > { %v710_v42 = vadd.f32 1.0, %v1359_v41  ;;  %v713_v45 = vmul.f32 -0.5, %v1359_v41  ;;  %v716_v49 = vand.u32 2147483647, %v1359_v41  ;;  %v720_v20 = vsub.f32 1.0, %v1359_v41 }
 0x5d6   : > { %1360 = vlog2.f32 %v710_v42  ;;  %v714_v48 = vadd.f32 1.0, %v713_v45  ;;  %vm717_vm14 = vcmp.lt.f32.partialorder %v716_v49, 0.0004427343  ;;  %v733_v56 = vand.u32 2147483648, %v710_v42 }
 0x5d7   : > { %1362 = vrcp.f32 %v710_v42  ;;  %v731_v60 = vand.u32 2147483647, %v710_v42  ;;  %vm727_vm0 = vweird.f32 %v710_v42 }
 0x5d8   : > { %v715_v53 = vmul.f32 %v1359_v41, %v714_v48  ;;  %v734_v0 = vor.u32 1.1754944e-38, %v733_v56 }
 0x5d9   : > { %vm732_vm5 = vcmp.eq.f32.partialorder %v731_v60, 8.507059e+37 }
 0x5dc   : > { %v1361_v47 = vpop.eup %1360 }
 0x5dd   : > { %v1363_v50 = vpop.eup %1362  ;;  %v712_v52 = vmul.f32 0.6931472, %v1361_v47 }
 0x5de   : > { %v723_v43 = vmul.f32 %v1363_v50, %v710_v42  ;;  %vm728_vm15 = vweird.f32 %v1363_v50 }
 0x5df   : > { %v718_v44 = vsel %vm717_vm14, %v715_v53, %v712_v52  ;;  %vm729_vm1 = vmor %vm727_vm0, %vm728_vm15 }
 0x5e0   : > { %v719_v54 = vadd.f32 %v718_v44, %v706_v36  ;;  %v724_v55 = vsub.f32 1.0, %v723_v43 }
 0x5e2   : > { %v725_v58 = vmul.f32 %v1363_v50, %v724_v55  ;;  %1275 = vmatmul.msk.f32.vlgmr.msrb.gmra.mxu1 %vm192_vm4, %v719_v54 }
 0x5e4   : > { %v726_v62 = vadd.f32 %v1363_v50, %v725_v58 }
 0x5e6   : > { %v730_v21 = vsel %vm729_vm1, %v1363_v50, %v726_v62 }
 0x5e7   : > { %v735_v22 = vsel %vm732_vm5, %v734_v0, %v730_v21 }
 0x5e8   : > { %v736_v23 = vmul.f32 %v735_v22, %v720_v20 }
 0x5ea   : > { %v738_v28 = vsub.f32 0.0, %v736_v23 }
 0x5ec   : > { %v739_v29 = vsel %vm737_vm6, %v738_v28, %v736_v23 }
 0x5ed   : > { %v865_v30 = vmul.f32 %v739_v29, %v1693_v57  ;;  %v866_v31 = vmul.f32 %v739_v29, %v1705_v61  ;;  %v867_v32 = vmul.f32 %v739_v29, %v1715_v63  ;;  %v868_v33 = vmul.f32 %v739_v29, %v1723_v17 }
 0x5ee   : > { %v858_v21 = vmul.f32 %v739_v29, %v739_v29 }
 0x5ef   : > { %1284 = vmatmul.msk.f32.vlgmr.msra.gmra.mxu1 %vm192_vm4, %v865_v30 }
 0x5f7   : > { %1285 = vmatmul.msk.f32.gmra.mxu1 %vm192_vm4, %v866_v31  ;;  %v859_v31 = vsub.f32 1.0, %v858_v21 }
 0x5ff   : > { %1286 = vmatmul.msk.f32.gmra.mxu1 %vm192_vm4, %v867_v32 }
 0x607   : > { %1287 = vmatmul.msk.f32.gmra.mxu1 %vm192_vm4, %v868_v33 }
 0x65f   : > { %v760_v51 = vpop.f32.mrf.mxu1 }
 0x660   : > { %v761_v40 = vadd.f32 %v760_v51, %v1729_v19 }
 0x662   : > { %v763_v35 = vand.u32 2147483647, %v761_v40  ;;  %vm784_vm11 = vcmp.lt.f32.partialorder %v761_v40, 0.0 }
 0x664   : > { %v764_v36 = vmul.f32 -2.0, %v763_v35 }
 0x666   : > { %v765_v38 = vmul.f32 1.442695, %v764_v36 }
 0x668   : > { %1364 = vpow2.f32 %v765_v38 }
 0x66c   : > { %v901_v62 = vpop.f32.mrf.mxu1 }
 0x66d   : > { %v913_v32 = vmul.f32 %v901_v62, %v901_v62 }
 0x66e   : > { %v1365_v39 = vpop.eup %1364 }
 0x66f   : > { %v768_v41 = vadd.f32 1.0, %v1365_v39  ;;  %v767_v43 = vsub.f32 1.0, %v1365_v39 }
 0x671   : > { %1366 = vrcp.f32 %v768_v41  ;;  %v780_v49 = vand.u32 2147483648, %v768_v41  ;;  %v778_v50 = vand.u32 2147483647, %v768_v41  ;;  %vm774_vm8 = vweird.f32 %v768_v41 }
 0x673   : > { %v781_v53 = vor.u32 1.1754944e-38, %v780_v49  ;;  %vm779_vm10 = vcmp.eq.f32.partialorder %v778_v50, 8.507059e+37 }
 0x674   : > { %v904_v0 = vpop.f32.mrf.mxu1 }
 0x675   : > { %v914_v28 = vmul.f32 %v904_v0, %v904_v0 }
 0x677   : > { %v1367_v42 = vpop.eup %1366  ;;  %v915_v36 = vadd.f32 %v914_v28, %v913_v32 }
 0x678   : > { %v770_v45 = vmul.f32 %v1367_v42, %v768_v41  ;;  %vm775_vm7 = vweird.f32 %v1367_v42 }
 0x679   : > { %vm776_vm9 = vmor %vm774_vm8, %vm775_vm7 }
 0x67a   : > { %v771_v48 = vsub.f32 1.0, %v770_v45 }
 0x67c   : > { %v772_v47 = vmul.f32 %v1367_v42, %v771_v48  ;;  %v907_v20 = vpop.f32.mrf.mxu1 }
 0x67d   : > { %v916_v51 = vmul.f32 %v907_v20, %v907_v20 }
 0x67e   : > { %v773_v52 = vadd.f32 %v1367_v42, %v772_v47 }
 0x67f   : > { %v917_v41 = vadd.f32 %v916_v51, %v915_v36 }
 0x680   : > { %v777_v44 = vsel %vm776_vm9, %v1367_v42, %v773_v52 }
 0x681   : > { %v782_v54 = vsel %vm779_vm10, %v781_v53, %v777_v44 }
 0x682   : > { %v783_v55 = vmul.f32 %v782_v54, %v767_v43 }
 0x684   : > { %v785_v56 = vsub.f32 0.0, %v783_v55 }
 0x686   : > { %v786_v58 = vsel %vm784_vm11, %v785_v56, %v783_v55 }
 0x687   : > { %v787_v60 = vmul.f32 %v786_v58, %v1733_v46  ;;  %v869_v22 = vmul.f32 %v786_v58, %v786_v58 }
 0x689   : > { %1276 = vmatmul.msk.f32.vlgmr.msrb.gmra.mxu0 %vm192_vm4, %v787_v60  ;;  %v870_v33 = vsub.f32 1.0, %v869_v22 }
 0x68a   : > { %1288 = vmatpush.msk.msrb.mxu0 %vm131_vm2, %v1601_v16 }
 0x68b   : > { %v871_v45 = vmul.f32 %v870_v33, %v1733_v46 }
 0x691   : > { %1278 = vmatmul.msk.f32.vlgmr.msra.gmra.mxu0 %vm127_vm3, %v1854_v34  ;;  %v910_v34 = vpop.f32.mrf.mxu1 }
 0x692   : > { %1060 = vmatpush.msra.mxu0 %v1572_v9  ;;  %v918_v38 = vmul.f32 %v910_v34, %v910_v34 }
 0x694   : > { %1061 = vmatpush.msra.mxu0 %v1567_v8  ;;  %v919_v48 = vadd.f32 %v918_v38, %v917_v41 }
 0x696   : > { %1062 = vmatpush.msra.mxu0 %v1562_v7  ;;  %v920_v49 = vmul.f32 %v919_v48, %v871_v45 }
 0x698   : > { %1063 = vmatpush.msra.mxu0 %v1557_v6  ;;  %v921_v47 = vsel %vm192_vm4, %v920_v49, 0.0 }
 0x706   : > { %v808_v23 = vpop.f32.mrf.mxu0 }
 0x707   : > { %v811_v30 = vadd.f32 %v808_v23, %v1733_v46 }
 0x709   : > { %v812_v40 = vmul.f32 %v811_v30, %v739_v29  ;;  %v860_v35 = vmul.f32 %v859_v31, %v811_v30 }
 0x70b   : > { %1279 = vmatmul.msk.f32.vlgmr.msra.gmra.mxu2 %vm192_vm4, %v812_v40  ;;  %v861_v39 = vmul.f32 %v860_v35, %v1745_v27 }
 0x70d   : > { %v862_v42 = vsel %vm192_vm4, %v861_v39, 0.0 }
 0x70e   : > { %863 = vadd.xlane.f32.xlu2 %v862_v42  ;;  %v830_v50 = vpop.f32.mrf.mxu0 }
 0x716   : > { %922 = vadd.xlane.f32.xlu2 %v921_v47 }
 0x78e   : > { %v853_v29 = vpop.f32.mrf.mxu2 }
 0x78f   : > { %v854_v52 = vadd.f32 %v853_v29, %v830_v50 }
 0x791   : > { %v856_v53 = vadd.f32 %v854_v52, %v601_v18 }
 0x793   : > { %v857_v43 = vadd.f32 %v856_v53, %v1757_v59 }
 0x795   : > { %v926_v44 = vsub.f32 0.0, %v857_v43 }
 0x797   : > { %v928_v54 = vmul.f32 0.125, %v926_v44 }
 0x799   : > { %v930_v55 = vmul.f32 0.33333334, %v928_v54  ;;  %v934_v56 = vadd.f32 %v1448_v1, %v928_v54  ;;  %v937_v1 = vmul.f32 %v1903_v37, %v1601_v16 }
 0x79b   : > { %v1894_v58 = vadd.f32 %v930_v55, %v1851_v26  ;;  %1289 = vmatmul.msk.f32.vlgmr.msrb.gmra.mxu0 %vm127_vm3, %v934_v56  ;;  %1297 = vmatmul.msk.f32.vlgmr.msrb.gmra.mxu2 %vm127_vm3, %v934_v56  ;;  %v938_v18 = vperm.slane %v937_v1, 4 }
 0x79c   : > { %1105 = vmatpush.msrb.mxu0 %v1552_v5 }
 0x79e   : > { %1106 = vmatpush.msrb.mxu0 %v1547_v4 }
 0x7a0   : > { %1107 = vmatpush.msrb.mxu0 %v1542_v3 }
 0x7a2   : > { %1108 = vmatpush.msrb.mxu0 %v1537_v2 }
 0x818   : > { %v959_v26 = vpop.f32.mrf.mxu0 }
 0x819   : > { %v960_v60 = vadd.f32 %v959_v26, %v938_v18 }
 0x81b   : > { %v962_v62 = vadd.f32 %v960_v60, %v1610_v24 }
 0x81d   : > { %v963_v0 = vand.u32 2147483647, %v962_v62  ;;  %vm994_vm0 = vcmp.lt.f32.partialorder %v962_v62, 0.0 }
 0x81f   : > { %v964_v20 = vmul.f32 -2.0, %v963_v0 }
 0x821   : > { %v965_v21 = vmul.f32 1.442695, %v964_v20 }
 0x823   : > { %1368 = vpow2.f32 %v965_v21 }
 0x829   : > { %v1369_v22 = vpop.eup %1368 }
 0x82a   : > { %v967_v23 = vadd.f32 1.0, %v1369_v22  ;;  %v970_v28 = vmul.f32 -0.5, %v1369_v22  ;;  %v973_v31 = vand.u32 2147483647, %v1369_v22  ;;  %v977_v49 = vsub.f32 1.0, %v1369_v22 }
 0x82c   : > { %1370 = vlog2.f32 %v967_v23  ;;  %v971_v30 = vadd.f32 1.0, %v970_v28  ;;  %vm974_vm2 = vcmp.lt.f32.partialorder %v973_v31, 0.0004427343  ;;  %v990_v39 = vand.u32 2147483648, %v967_v23 }
 0x82d   : > { %1372 = vrcp.f32 %v967_v23  ;;  %v988_v42 = vand.u32 2147483647, %v967_v23  ;;  %vm984_vm13 = vweird.f32 %v967_v23 }
 0x82e   : > { %v972_v51 = vmul.f32 %v1369_v22, %v971_v30  ;;  %v991_v48 = vor.u32 1.1754944e-38, %v990_v39 }
 0x82f   : > { %vm989_vm15 = vcmp.eq.f32.partialorder %v988_v42, 8.507059e+37 }
 0x832   : > { %v1371_v32 = vpop.eup %1370 }
 0x833   : > { %v1373_v34 = vpop.eup %1372  ;;  %v969_v33 = vmul.f32 0.6931472, %v1371_v32 }
 0x834   : > { %v980_v40 = vmul.f32 %v1373_v34, %v967_v23  ;;  %vm985_vm12 = vweird.f32 %v1373_v34 }
 0x835   : > { %v975_v35 = vsel %vm974_vm2, %v972_v51, %v969_v33  ;;  %vm986_vm14 = vmor %vm984_vm13, %vm985_vm12 }
 0x836   : > { %v976_v36 = vadd.f32 %v975_v35, %v963_v0  ;;  %v981_v38 = vsub.f32 1.0, %v980_v40 }
 0x838   : > { %v982_v41 = vmul.f32 %v1373_v34, %v981_v38  ;;  %1294 = vmatmul.msk.f32.vlgmr.msrb.gmra.mxu3 %vm192_vm4, %v976_v36 }
 0x83a   : > { %v983_v45 = vadd.f32 %v1373_v34, %v982_v41 }
 0x83c   : > { %v987_v47 = vsel %vm986_vm14, %v1373_v34, %v983_v45 }
 0x83d   : > { %v992_v50 = vsel %vm989_vm15, %v991_v48, %v987_v47 }
 0x83e   : > { %v993_v29 = vmul.f32 %v992_v50, %v977_v49 }
 0x840   : > { %v995_v52 = vsub.f32 0.0, %v993_v29 }
 0x842   : > { %v996_v53 = vsel %vm994_vm0, %v995_v52, %v993_v29 }
 0x843   : > { %v1124_v43 = vmul.f32 %v996_v53, %v1693_v57  ;;  %v1125_v44 = vmul.f32 %v996_v53, %v1705_v61  ;;  %v1126_v54 = vmul.f32 %v996_v53, %v1715_v63  ;;  %v1127_v55 = vmul.f32 %v996_v53, %v1723_v17 }
 0x845   : > { %1303 = vmatmul.msk.f32.vlgmr.msra.gmra.mxu3 %vm192_vm4, %v1124_v43 }
 0x84d   : > { %1304 = vmatmul.msk.f32.gmra.mxu3 %vm192_vm4, %v1125_v44  ;;  %v1117_v44 = vmul.f32 %v996_v53, %v996_v53 }
 0x855   : > { %1305 = vmatmul.msk.f32.gmra.mxu3 %vm192_vm4, %v1126_v54 }
 0x85d   : > { %1306 = vmatmul.msk.f32.gmra.mxu3 %vm192_vm4, %v1127_v55 }
 0x8bb   : > { %v1017_v56 = vpop.f32.mrf.mxu3 }
 0x8bc   : > { %v1018_v1 = vadd.f32 %v1017_v56, %v1729_v19  ;;  %v1118_v56 = vsub.f32 1.0, %v1117_v44 }
 0x8be   : > { %v1020_v18 = vand.u32 2147483647, %v1018_v1  ;;  %vm1041_vm8 = vcmp.lt.f32.partialorder %v1018_v1, 0.0 }
 0x8c0   : > { %v1021_v26 = vmul.f32 -2.0, %v1020_v18 }
 0x8c2   : > { %v1022_v57 = vmul.f32 1.442695, %v1021_v26 }
 0x8c4   : > { %1374 = vpow2.f32 %v1022_v57 }
 0x8c8   : > { %v1160_v60 = vpop.f32.mrf.mxu3 }
 0x8c9   : > { %v1172_v36 = vmul.f32 %v1160_v60, %v1160_v60  ;;  %v406_v60 = vpop.xlane.xlu0 %405 }
 0x8ca   : > { %v1375_v62 = vpop.eup %1374 }
 0x8cb   : > { %v1025_v61 = vadd.f32 1.0, %v1375_v62  ;;  %v1024_v31 = vsub.f32 1.0, %v1375_v62  ;;  %v669_v62 = vpop.xlane.xlu1 %668 }
 0x8cd   : > { %1376 = vrcp.f32 %v1025_v61  ;;  %v1037_v22 = vand.u32 2147483648, %v1025_v61  ;;  %v1035_v17 = vand.u32 2147483647, %v1025_v61  ;;  %vm1031_vm5 = vweird.f32 %v1025_v61 }
 0x8cf   : > { %v1038_v19 = vor.u32 1.1754944e-38, %v1037_v22  ;;  %vm1036_vm7 = vcmp.eq.f32.partialorder %v1035_v17, 8.507059e+37 }
 0x8d0   : > { %v1163_v0 = vpop.f32.mrf.mxu3 }
 0x8d1   : > { %v1173_v51 = vmul.f32 %v1163_v0, %v1163_v0  ;;  %v343_v0 = vpop.xlane.xlu0 %342 }
 0x8d3   : > { %v1377_v20 = vpop.eup %1376  ;;  %v1174_v45 = vadd.f32 %v1173_v51, %v1172_v36  ;;  %v1113_v36 = vmul.f32 %v1903_v37, %v1587_v12 }
 0x8d4   : > { %v1027_v63 = vmul.f32 %v1377_v20, %v1025_v61  ;;  %vm1032_vm1 = vweird.f32 %v1377_v20  ;;  %v864_v61 = vpop.xlane.xlu2 %863 }
 0x8d5   : > { %vm1033_vm6 = vmor %vm1031_vm5, %vm1032_vm1 }
 0x8d6   : > { %v1028_v21 = vsub.f32 1.0, %v1027_v63  ;;  %v409_v63 = vperm.slane %v1599_v15, 0 }
 0x8d8   : > { %v1029_v23 = vmul.f32 %v1377_v20, %v1028_v21  ;;  %v1166_v28 = vpop.f32.mrf.mxu3  ;;  %v407_v21 = vadd.f32 %v406_v60, %v343_v0 }
 0x8d9   : > { %v1175_v38 = vmul.f32 %v1166_v28, %v1166_v28 }
 0x8da   : > { %v1030_v30 = vadd.f32 %v1377_v20, %v1029_v23  ;;  %v411_v23 = vadd.f32 %v409_v63, %v407_v21 }
 0x8db   : > { %v1176_v47 = vadd.f32 %v1175_v38, %v1174_v45 }
 0x8dc   : > { %v1034_v32 = vsel %vm1033_vm6, %v1377_v20, %v1030_v30  ;;  %v610_v20 = vpop.xlane.xlu1 %609  ;;  %v923_v22 = vpop.xlane.xlu2 %922  ;;  %v413_v28 = vsub.f32 0.0, %v411_v23 }
 0x8dd   : > { %v1039_v34 = vsel %vm1036_vm7, %v1038_v19, %v1034_v32 }
 0x8de   : > { %v1040_v33 = vmul.f32 %v1039_v34, %v1024_v31 }
 0x8e0   : > { %v1042_v40 = vsub.f32 0.0, %v1040_v33  ;;  %v1169_v35 = vpop.f32.mrf.mxu3 }
 0x8e1   : > { %v1177_v48 = vmul.f32 %v1169_v35, %v1169_v35 }
 0x8e2   : > { %v1043_v39 = vsel %vm1041_vm8, %v1042_v40, %v1040_v33 }
 0x8e3   : > { %v1044_v41 = vmul.f32 %v1043_v39, %v1733_v46  ;;  %v1128_v42 = vmul.f32 %v1043_v39, %v1043_v39  ;;  %v1178_v50 = vadd.f32 %v1177_v48, %v1176_v47  ;;  %v1114_v48 = vperm.slane %v1113_v36, 4  ;;  %v1087_v47 = vpop.f32.mrf.mxu2 }
 0x8e5   : > { %v1129_v49 = vsub.f32 1.0, %v1128_v42  ;;  %1295 = vmatmul.msk.f32.vlgmr.msra.gmra.mxu0 %vm192_vm4, %v1044_v41 }
 0x8e7   : > { %v1130_v29 = vmul.f32 %v1129_v49, %v1733_v46 }
 0x8e9   : > { %v1179_v52 = vmul.f32 %v1178_v50, %v1130_v29 }
 0x8eb   : > { %v1180_v43 = vsel %vm192_vm4, %v1179_v52, 0.0 }
 0x8ec   : > { %1181 = vadd.xlane.f32.xlu1 %v1180_v43 }
 0x95f   : > { %v1182_v34 = vpop.xlane.xlu1 %1181 }
 0x962   : > { %v1065_v54 = vpop.f32.mrf.mxu0 }
 0x963   : > { %v1068_v55 = vadd.f32 %v1065_v54, %v1733_v46  ;;  %v670_v46 = vadd.f32 %v669_v62, %v610_v20 }
 0x965   : > { %v1069_v1 = vmul.f32 %v1068_v55, %v996_v53  ;;  %v1119_v18 = vmul.f32 %v1118_v56, %v1068_v55  ;;  %v924_v53 = vadd.f32 %v923_v22, %v864_v61  ;;  %v671_v17 = vadd.f32 %v670_v46, %v409_v63 }
 0x967   : > { %1298 = vmatmul.msk.f32.vlgmr.msrb.gmra.mxu0 %vm192_vm4, %v1069_v1  ;;  %v1120_v26 = vmul.f32 %v1119_v18, %v1745_v27  ;;  %v925_v30 = vadd.f32 %v924_v53, %v409_v63  ;;  %v673_v19 = vsub.f32 0.0, %v671_v17  ;;  %v415_v27 = vmul.f32 0.125, %v413_v28 }
 0x969   : > { %v1121_v57 = vsel %vm192_vm4, %v1120_v26, 0.0  ;;  %v927_v31 = vsub.f32 0.0, %v925_v30  ;;  %v675_v32 = vmul.f32 0.125, %v673_v19  ;;  %v418_v51 = vmul.f32 0.16666667, %v415_v27 }
 0x96a   : > { %1122 = vadd.xlane.f32.xlu0 %v1121_v57  ;;  %v1458_v57 = vmov (%p115_p0), 0.0   ;;  %vm1200_vm4 = vcmask (%p115_p0), 39968  }
 0x96b   : > { %v929_v40 = vmul.f32 0.125, %v927_v31  ;;  %v678_v38 = vmul.f32 0.33333334, %v675_v32  ;;  %v419_v41 = vadd.f32 %v1444_v25, %v418_v51  ;;  %1193 = vst [vmem:[#allocation6] sm:$0xff] (%p115_p0), %v1458_v57 }
 0x96d   : > { %v932_v42 = vmul.f32 0.33333334, %v929_v40  ;;  %v679_v49 = vadd.f32 %v678_v38, %v419_v41 }
 0x96f   : > { %v933_v43 = vadd.f32 %v932_v42, %v679_v49 }
 0x9dd   : > { %v1123_v33 = vpop.xlane.xlu0 %1122 }
 0x9de   : > { %v1183_v35 = vadd.f32 %v1182_v34, %v1123_v33 }
 0x9e0   : > { %v1184_v39 = vadd.f32 %v1183_v35, %v409_v63 }
 0x9e2   : > { %v1186_v45 = vsub.f32 0.0, %v1184_v39 }
 0x9e4   : > { %v1188_v50 = vmul.f32 0.125, %v1186_v45  ;;  %v1110_v29 = vpop.f32.mrf.mxu0 }
 0x9e5   : > { %v1111_v52 = vadd.f32 %v1110_v29, %v1087_v47 }
 0x9e6   : > { %v1191_v44 = vmul.f32 0.16666667, %v1188_v50 }
 0x9e7   : > { %v1115_v54 = vadd.f32 %v1114_v48, %v1111_v52 }
 0x9e8   : > { %v1192_v55 = vadd.f32 %v1191_v44, %v933_v43  }
 0x9e9   : > { %v1116_v56 = vadd.f32 %v1115_v54, %v1757_v59 }
 0x9ea   : > { %v1956_v25 = vmov %v1192_v55  ;;  %1197 = vrot.lane.b32.xlu0 (%p115_p0), %v1192_v55, %s1457_s17 }
 0x9eb   : > { %v1185_v1 = vsub.f32 0.0, %v1116_v56 }
 0x9ed   : > { %v1187_v37 = vmul.f32 0.125, %v1185_v1 }
 0x9ef   : > { %v1189_v18 = vmul.f32 0.16666667, %v1187_v37  ;;  %117 = sbr.rel (!%p115_p0) target bundleno = 146 (0x92), region = 79 }
 0x9f1   : > { %v1190_v26 = vadd.f32 %v1189_v18, %v1894_v58  }
 0x9f3   : > { %v1957_v1 = vmov %v1190_v26  ;;  %1195 = vst.msk [vmem:[#allocation6] sm:$0xff] (%p115_p0), %vm127_vm3, %v1190_v26 }
 0xa5c   :  { %v1198_v59 = vpop.permute.xlu0 %1197 }
 0xa5d   :  { %1201 = vst.msk [vmem:[#allocation6] sm:$0xff] %vm1200_vm4, %v1198_v59 }
 0xa5e   :  { %1212 = dma.vmem_to_hbm [thread:$0]  %s1208_s19, 128, %s1210_s21, [#allocation5]  }
 0xa5f   :  { %1440 = dma.done.wait [#allocation5], 128  }
 0xa60   :  { %1441 = vsyncadd [#allocation5], 4294967168 }
 0xa61   :  { %1217 = vsyncpa [#allocation4], 1 }
 0xa62   :  { %1218 = vsyncpa [#allocation5], 1 }

</bundles_post_ra>
